<compile_context>
chip_gen: v5e
topology: v5e:2x2
jax: 0.10.0
libtpu: 0.0.40
codegen_flags: <defaults>
</compile_context>

<pallas_src>
import functools
import itertools

import numpy as np
import jax
import jax.numpy as jnp
from jax import lax
from jax.experimental import pallas as pl
from jax.experimental.pallas import tpu as pltpu


# ----------------------------------------------------------------------------- helpers
def _round_up(x, m):
    return ((x + m - 1) // m) * m


def _pad_axis(x, axis, target, value=0.0):
    pad = target - x.shape[axis]
    if pad <= 0:
        return x
    widths = [(0, 0)] * x.ndim
    widths[axis] = (0, pad)
    return jnp.pad(x, widths, constant_values=value)


def _choose_hw_tiling(hw, rows, max_tile=4096, temp_budget_bytes=24 << 20):
    # Tile as large as possible (HBM efficiency), capped by max_tile and by keeping the
    # ~14 live [rows, tk] f32 elementwise temporaries inside temp_budget_bytes.
    # HW is padded UP to a multiple of the tile (no divisor search; padding is safe).
    cap = (temp_budget_bytes // (14 * 4 * max(rows, 8))) // 128 * 128
    cap = max(512, min(max_tile, cap))
    hw128 = _round_up(max(hw, 1), 128)
    nkt = max(1, -(-hw128 // cap))
    tk = _round_up(-(-hw128 // nkt), 128)
    return tk, tk * nkt, nkt


def _nearest_resize(masks, out_hw):
    # masks: [B, NT, Hg, Wg] -> [B, NT, H, W], PyTorch F.interpolate(mode='nearest') indexing
    _, _, hg, wg = masks.shape
    h, w = out_hw
    ridx = jnp.floor(jnp.arange(h) * (hg / h)).astype(jnp.int32)
    cidx = jnp.floor(jnp.arange(w) * (wg / w)).astype(jnp.int32)
    return masks[:, :, ridx][:, :, :, cidx]


def _dot_t(a, b):
    # a: [n, k], b: [m, k] -> [n, m]  (contract last dims; f32 accumulation)
    return lax.dot_general(a, b, (((1,), (1,)), ((), ())),
                           preferred_element_type=jnp.float32)


# ----------------------------------------------------------------------------- kernel
def _cost_kernel(logits_ref, onehotT_ref, sumtg_ref, octr_ref, tctrT_ref,
                 opar_ref, tparT_ref, outm_ref, tgtm_ref,
                 out_ref,
                 acc_fdot, acc_dice, acc_fneg, acc_pin,
                 *, alpha, gamma, inv_hw, w_class, w_mask, w_dice, w_center,
                 w_param, w_param_offset):
    f32 = jnp.float32
    bf16 = jnp.bfloat16
    k = pl.program_id(2)

    @pl.when(k == 0)
    def _init():
        acc_fdot[...] = jnp.zeros_like(acc_fdot)
        acc_dice[...] = jnp.zeros_like(acc_dice)
        acc_fneg[...] = jnp.zeros_like(acc_fneg)
        acc_pin[...] = jnp.zeros_like(acc_pin)

    # ---- per-HW-tile focal / dice partial sums ---------------------------------
    x = outm_ref[0].astype(f32)              # [tq, tk]  (bf16 in HBM, f32 elementwise)
    tgtm = tgtm_ref[0]                       # [nt16, tk] bf16, exact 0/1
    tq, tk = x.shape
    nt16 = tgtm.shape[0]

    e = jnp.exp(-jnp.abs(x))                 # one transcendental reused below
    u = 1.0 + e
    s = pl.reciprocal(u, approx=True)        # sigmoid(|x|)
    p = jnp.where(x >= 0.0, s, 1.0 - s)      # sigmoid(x)
    t = jnp.maximum(x, 0.0) + jnp.log(u)     # BCE(x, 0);  BCE(x, 1) = t - x
    q1 = 1.0 - p
    if gamma == 2.0:                         # VALU squares, not pow -> exp/log on EUP
        mod_pos = q1 * q1
        mod_neg = p * p
    else:
        mod_pos = jnp.maximum(q1, 1e-12) ** gamma
        mod_neg = jnp.maximum(p, 1e-12) ** gamma
    g_pos = mod_pos * (t - x)
    g_neg = mod_neg * t
    # fused focal: dot(fp, tgt) + dot(fn, 1-tgt) = dot(fp - fn, tgt) + rowsum(fn);
    # (1-alpha) on the rowsum is folded into the finalize combine.
    fdiff = alpha * g_pos - (1.0 - alpha) * g_neg

    # single stacked MXU pass: [fdiff; prob] (2*tq rows) vs tgtm
    lhs = jnp.concatenate([fdiff.astype(bf16), p.astype(bf16)], axis=0)   # [2*tq, tk]
    res = _dot_t(lhs, tgtm)                                               # [2*tq, nt16]
    acc_fdot[:, :nt16] += res[:tq]
    acc_dice[:, :nt16] += res[tq:]

    # lane-group partial sums: VPU adds only, one cross-lane reduce at finalize
    fn128 = g_neg[:, 0:128]
    pr128 = p[:, 0:128]
    for g in range(1, tk // 128):
        lo = g * 128
        fn128 = fn128 + g_neg[:, lo:lo + 128]
        pr128 = pr128 + p[:, lo:lo + 128]
    acc_fneg[...] += fn128
    acc_pin[...] += pr128

    # ---- finalize: cheap per-image costs + combine ------------------------------
    @pl.when(k == pl.num_programs(2) - 1)
    def _finalize():
        logits = logits_ref[0]               # [tq, NC]
        onehotT = onehotT_ref[0]             # [NC, nta]
        sum_tg = sumtg_ref[0]                # [1, nta]   (precomputed target rowsum)
        octr = octr_ref[0]                   # [tq, DC]
        tctrT = tctrT_ref[0]                 # [DC, nta]
        opar = opar_ref[0]                   # [tq, DP]
        tparT = tparT_ref[0]                 # [DP, nta]

        nq, nc = logits.shape
        dc = octr.shape[1]
        dp = opar.shape[1]
        nta = onehotT.shape[1]

        # classification cost: -softmax(logits)[:, tgt_ids]; small-NC VPU loop
        # (a K=NC matmul would waste a padded-to-128 MXU pass).
        z = logits - jnp.max(logits, axis=-1, keepdims=True)
        ez = jnp.exp(z)
        prob_cls = ez / jnp.sum(ez, axis=-1, keepdims=True)
        cost_class = jnp.zeros((nq, nta), f32)
        for c in range(nc):
            cost_class = cost_class - prob_cls[:, c:c + 1] * onehotT[c:c + 1, :]

        # focal mask & dice costs from the accumulators
        fneg_sum = (1.0 - alpha) * jnp.sum(acc_fneg[...], axis=-1, keepdims=True)
        pin_sum = jnp.sum(acc_pin[...], axis=-1, keepdims=True)
        cost_mask = (acc_fdot[...] + fneg_sum) * inv_hw
        cost_dice = 1.0 - (2.0 * acc_dice[...] + 1.0) / (pin_sum + sum_tg + 1.0)

        # center cost: pairwise L2 (torch.cdist p=2), VPU loop over DC
        sq = jnp.zeros((nq, nta), f32)
        for d in range(dc):
            diff = octr[:, d:d + 1] - tctrT[d:d + 1, :]
            sq = sq + diff * diff
        cost_center = jnp.sqrt(sq)

        # param L1, offset and cosine, VPU loops over DP
        l1 = jnp.zeros((nq, nta), f32)
        onorm_sq = jnp.zeros((nq, 1), f32)
        tnorm_sq = jnp.zeros((1, nta), f32)
        for d in range(dp):
            od = opar[:, d:d + 1]
            td = tparT[d:d + 1, :]
            l1 = l1 + jnp.abs(od - td)
            onorm_sq = onorm_sq + od * od
            tnorm_sq = tnorm_sq + td * td
        onorm = jnp.sqrt(onorm_sq)
        tnorm = jnp.sqrt(tnorm_sq)
        cost_offset = jnp.abs(onorm - tnorm)

        inv_on = 1.0 / jnp.maximum(onorm, 1e-12)   # F.normalize semantics (eps=1e-12)
        inv_tn = 1.0 / jnp.maximum(tnorm, 1e-12)
        cosm = jnp.zeros((nq, nta), f32)
        for d in range(dp):
            cosm = cosm + (opar[:, d:d + 1] * inv_on) * (tparT[d:d + 1, :] * inv_tn)
        cosm = jnp.clip(cosm, -0.999999, 0.999999)

        cbase = (w_mask * cost_mask + w_class * cost_class + w_dice * cost_dice +
                 w_center * cost_center + w_param * l1 + w_param_offset * cost_offset)

        out_ref[0, 0] = cbase               # lane-dense (nta = multiple of 128)
        out_ref[0, 1] = cosm


# ----------------------------------------------------------------------------- wrapper
def compute_cost_matrices(pred_logits, pred_mask_logits, pred_centers, pred_params,
                          tgt_labels, tgt_masks, tgt_centers, tgt_params,
                          *, cost_class=1.0, cost_mask=20.0, cost_dice=1.0,
                          cost_center=0.5, cost_param=1.0, cost_param_offset=0.01,
                          cost_param_normal_angle=0.0028, alpha=0.25, gamma=2.0):
    f32, bf16 = jnp.float32, jnp.bfloat16
    B, NQ, NC = pred_logits.shape
    H, W = pred_mask_logits.shape[-2:]
    NT = tgt_labels.shape[1]
    DC = pred_centers.shape[-1]
    DP = pred_params.shape[-1]

    HW = H * W
    NQ_pad = _round_up(NQ, 16)              # bf16 packs 2 rows / sublane
    NT16 = _round_up(NT, 16)                # minimal sublane padding for the big stream
    NT_acc = _round_up(NT16, 128)           # lane-dense accumulators / output slab

    # v7x megacore: add a parallel NQ-block axis when the batch alone can't fill 2 TCs.
    nqb = 2 if (B < 2 and NQ_pad >= 32 and NQ_pad % 32 == 0) else 1
    tq = NQ_pad // nqb

    tk, HW_pad, nkt = _choose_hw_tiling(HW, tq)

    # --- glue: layout / padding only ---
    logits_p = _pad_axis(pred_logits.astype(f32), 1, NQ_pad)                        # [B,NQp,NC]
    onehotT_p = _pad_axis(jnp.transpose(jax.nn.one_hot(tgt_labels, NC, dtype=f32),
                                        (0, 2, 1)), 2, NT_acc)                      # [B,NC,NTa]

    outm = pred_mask_logits.reshape(B, NQ, HW).astype(f32)
    # pad value -30 -> sigmoid ~ 0, focal_neg ~ 0: padded pixels contribute nothing.
    outm_p = _pad_axis(_pad_axis(outm, 1, NQ_pad, -30.0), 2, HW_pad, -30.0).astype(bf16)

    tgtm = _nearest_resize(tgt_masks.astype(f32), (H, W)).reshape(B, NT, HW)
    sum_tg_p = _pad_axis(tgtm.sum(-1), 1, NT_acc).reshape(B, 1, NT_acc)              # [B,1,NTa]
    tgtm_p = _pad_axis(_pad_axis(tgtm, 1, NT16), 2, HW_pad).astype(bf16)             # [B,NT16,HWp]

    octr_p = _pad_axis(pred_centers.astype(f32), 1, NQ_pad)                          # [B,NQp,DC]
    tctrT_p = _pad_axis(jnp.transpose(tgt_centers.astype(f32), (0, 2, 1)), 2, NT_acc)
    opar_p = _pad_axis(pred_params.astype(f32), 1, NQ_pad)                           # [B,NQp,DP]
    tparT_p = _pad_axis(jnp.transpose(tgt_params.astype(f32), (0, 2, 1)), 2, NT_acc)

    kernel = functools.partial(
        _cost_kernel, alpha=alpha, gamma=gamma, inv_hw=1.0 / HW,
        w_class=cost_class, w_mask=cost_mask, w_dice=cost_dice, w_center=cost_center,
        w_param=cost_param, w_param_offset=cost_param_offset)

    # VMEM budget: double-buffered bf16 mask tiles + elementwise f32 temps + scratch.
    bytes_masks = 2 * (tq + NT16) * tk * 2 * 2
    bytes_small = 2 * 4 * (tq * NC + NC * NT_acc + NT_acc + tq * DC + DC * NT_acc
                           + tq * DP + DP * NT_acc)
    bytes_out = 2 * 4 * 2 * tq * NT_acc
    bytes_scratch = 4 * (2 * tq * NT_acc + 2 * tq * 128)
    bytes_temps = 14 * tq * tk * 4 + 2 * tq * tk * 2
    vmem_limit = int(min(max(2 * (bytes_masks + bytes_small + bytes_out
                                  + bytes_scratch + bytes_temps),
                             16 * 1024 * 1024), 48 * 1024 * 1024))

    cost_est = pl.CostEstimate(
        flops=int(B * (2.0 * (2 * NQ_pad) * NT16 * HW_pad + 25.0 * NQ_pad * HW_pad
                       + 2.0 * NQ_pad * NT_acc * NC)),
        transcendentals=int(B * 3.0 * NQ_pad * HW_pad),
        bytes_accessed=int((outm_p.size + tgtm_p.size) * 2
                           + (logits_p.size + onehotT_p.size + sum_tg_p.size + octr_p.size
                              + tctrT_p.size + opar_p.size + tparT_p.size) * 4
                           + B * 2 * NQ_pad * NT_acc * 4))

    out = pl.pallas_call(
        kernel,
        grid=(B, nqb, nkt),
        in_specs=[
            pl.BlockSpec((1, tq, NC), lambda b, q, k: (b, q, 0)),
            pl.BlockSpec((1, NC, NT_acc), lambda b, q, k: (b, 0, 0)),
            pl.BlockSpec((1, 1, NT_acc), lambda b, q, k: (b, 0, 0)),
            pl.BlockSpec((1, tq, DC), lambda b, q, k: (b, q, 0)),
            pl.BlockSpec((1, DC, NT_acc), lambda b, q, k: (b, 0, 0)),
            pl.BlockSpec((1, tq, DP), lambda b, q, k: (b, q, 0)),
            pl.BlockSpec((1, DP, NT_acc), lambda b, q, k: (b, 0, 0)),
            pl.BlockSpec((1, tq, tk), lambda b, q, k: (b, q, k)),
            pl.BlockSpec((1, NT16, tk), lambda b, q, k: (b, 0, k)),
        ],
        out_specs=pl.BlockSpec((1, 2, tq, NT_acc), lambda b, q, k: (b, 0, q, 0)),
        out_shape=jax.ShapeDtypeStruct((B, 2, NQ_pad, NT_acc), f32),
        scratch_shapes=[
            pltpu.VMEM((tq, NT_acc), f32),   # acc_fdot (first NT16 cols used)
            pltpu.VMEM((tq, NT_acc), f32),   # acc_dice
            pltpu.VMEM((tq, 128), f32),      # acc_fneg lane-group partial sums
            pltpu.VMEM((tq, 128), f32),      # acc prob lane-group partial sums
        ],
        compiler_params=pltpu.CompilerParams(
            dimension_semantics=("parallel", "parallel", "arbitrary"),
            vmem_limit_bytes=vmem_limit),
        cost_estimate=cost_est,
    )(logits_p, onehotT_p, sum_tg_p, octr_p, tctrT_p, opar_p, tparT_p, outm_p, tgtm_p)

    cbase = out[:, 0, :NQ, :NT]
    cosm = out[:, 1, :NQ, :NT]
    # TODO(synk): arccos has no guaranteed Mosaic lowering; tiny [B,NQ,NT] elementwise finish in glue.
    angle_deg = jnp.arccos(cosm) * (180.0 / np.pi)
    return cbase + cost_param_normal_angle * angle_deg


def _linear_sum_assignment_bruteforce(C):
    # Exact optimal assignment for small matrices (NQ >= NT).
    # TODO(synk): scipy.optimize.linear_sum_assignment (Hungarian) has no Pallas equivalent; host-side.
    C = np.asarray(C)
    nq, nt = C.shape
    best_rows, best_cost = None, None
    for rows in itertools.permutations(range(nq), nt):
        cost = sum(C[rows[j], j] for j in range(nt))
        if best_cost is None or cost < best_cost:
            best_cost, best_rows = cost, rows
    pairs = sorted(zip(best_rows, range(nt)))
    return (np.array([p[0] for p in pairs], dtype=np.int64),
            np.array([p[1] for p in pairs], dtype=np.int64))


class HungarianMatcherPallas:
    def __init__(self, cost_class=1.0, cost_mask=20.0, cost_dice=1.0, cost_center=0.5,
                 cost_param=1.0, cost_param_offset=0.01, cost_param_normal_angle=0.0028,
                 param_on=True):
        assert cost_class != 0 or cost_mask != 0 or cost_dice != 0 or cost_center != 0 or cost_param != 0
        self.w = dict(cost_class=cost_class, cost_mask=cost_mask, cost_dice=cost_dice,
                      cost_center=cost_center, cost_param=cost_param,
                      cost_param_offset=cost_param_offset,
                      cost_param_normal_angle=cost_param_normal_angle)
        self.param_on = param_on

    def __call__(self, outputs, targets):
        labels = jnp.stack([t['labels'] for t in targets])
        masks = jnp.stack([t['masks'] for t in targets])
        centers = jnp.stack([t['plane_centers'] for t in targets])
        params = jnp.stack([t['plane_params'] for t in targets])
        C = compute_cost_matrices(outputs['pred_logits'], outputs['pred_mask_logits'],
                                  outputs['pred_centers'], outputs['pred_params'],
                                  labels, masks, centers, params, **self.w)
        C = jax.block_until_ready(C)
        C_np = np.asarray(jax.device_get(C))
        return [_linear_sum_assignment_bruteforce(C_np[b]) for b in range(C_np.shape[0])], C


# ----------------------------------------------------------------------------- reference
def _reference_cost(pred_logits, pred_mask_logits, pred_centers, pred_params,
                    labels, masks, centers, params, w, alpha=0.25, gamma=2.0):
    # pure-jnp replica of the cost matrix for a sanity check
    B, NQ, NC = pred_logits.shape
    H, W = pred_mask_logits.shape[-2:]
    NT = labels.shape[1]
    prob = jax.nn.softmax(pred_logits, -1)
    oh = jax.nn.one_hot(labels, NC, dtype=jnp.float32)
    cc = -jnp.einsum('bnc,bmc->bnm', prob, oh)
    om = pred_mask_logits.reshape(B, NQ, H * W).astype(jnp.float32)
    tm = _nearest_resize(masks.astype(jnp.float32), (H, W)).reshape(B, NT, H * W)
    p = jax.nn.sigmoid(om)
    bce1 = jnp.maximum(om, 0) - om + jnp.log1p(jnp.exp(-jnp.abs(om)))
    bce0 = jnp.maximum(om, 0) + jnp.log1p(jnp.exp(-jnp.abs(om)))
    fp = (1 - p) ** gamma * bce1 * alpha
    fn = p ** gamma * bce0 * (1 - alpha)
    cm = (jnp.einsum('bnc,bmc->bnm', fp, tm) + jnp.einsum('bnc,bmc->bnm', fn, 1 - tm)) / (H * W)
    cd = 1 - (2 * jnp.einsum('bnc,bmc->bnm', p, tm) + 1) / (p.sum(-1)[:, :, None] + tm.sum(-1)[:, None, :] + 1)
    cctr = jnp.sqrt(jnp.sum((pred_centers[:, :, None, :] - centers[:, None, :, :]) ** 2, -1))
    cpar = jnp.sum(jnp.abs(pred_params[:, :, None, :] - params[:, None, :, :]), -1)
    on = jnp.linalg.norm(pred_params, axis=-1, keepdims=True)
    tn = jnp.linalg.norm(params, axis=-1, keepdims=True)
    coff = jnp.abs(on[:, :, None, 0] - tn[:, None, :, 0])
    opn = pred_params / jnp.maximum(on, 1e-12)
    tpn = params / jnp.maximum(tn, 1e-12)
    cosm = jnp.clip(jnp.einsum('bnd,bmd->bnm', opn, tpn), -0.999999, 0.999999)
    ang = jnp.arccos(cosm) * 180.0 / np.pi
    return (w['cost_mask'] * cm + w['cost_class'] * cc + w['cost_dice'] * cd +
            w['cost_center'] * cctr + w['cost_param'] * cpar +
            w['cost_param_offset'] * coff + w['cost_param_normal_angle'] * ang)


if __name__ == "__main__":
    key = jax.random.PRNGKey(0)
    B, NQ, NC, H, W, NT, Hg, Wg, DC, DP = 2, 8, 5, 16, 16, 4, 8, 8, 3, 3
    ks = jax.random.split(key, 8)
    outputs = {
        'pred_logits': jax.random.normal(ks[0], (B, NQ, NC), jnp.float32),
        'pred_mask_logits': jax.random.normal(ks[1], (B, NQ, H, W), jnp.float32),
        'pred_centers': jax.random.normal(ks[2], (B, NQ, DC), jnp.float32),
        'pred_params': jax.random.normal(ks[3], (B, NQ, DP), jnp.float32) + 0.5,
    }
    labels = jax.random.randint(ks[4], (B, NT), 0, NC)
    masks = (jax.random.uniform(ks[5], (B, NT, Hg, Wg)) > 0.5).astype(jnp.float32)
    centers = jax.random.normal(ks[6], (B, NT, DC), jnp.float32)
    params = jax.random.normal(ks[7], (B, NT, DP), jnp.float32) + 0.5
    targets = [{'labels': labels[b], 'masks': masks[b],
                'plane_centers': centers[b], 'plane_params': params[b]} for b in range(B)]

    matcher = HungarianMatcherPallas()
    indices, C = matcher(outputs, targets)
    jax.block_until_ready(C)

    C_ref = _reference_cost(outputs['pred_logits'], outputs['pred_mask_logits'],
                            outputs['pred_centers'], outputs['pred_params'],
                            labels, masks, centers, params, matcher.w)
    np.testing.assert_allclose(np.asarray(C), np.asarray(C_ref), rtol=5e-2, atol=5e-2)

    assert len(indices) == B
    for i, j in indices:
        assert i.shape == (min(NQ, NT),) and j.shape == (min(NQ, NT),)
    print("KERNEL_OK")
</pallas_src>

<mosaic_0001>
module attributes {stable_mosaic.version = 11 : i64} {
  func.func @_cost_kernel(%arg0: i32, %arg1: i32, %arg2: i32, %arg3: memref<1x16x5xf32, #tpu.memory_space<vmem>>, %arg4: memref<1x5x128xf32, #tpu.memory_space<vmem>>, %arg5: memref<1x1x128xf32, #tpu.memory_space<vmem>>, %arg6: memref<1x16x3xf32, #tpu.memory_space<vmem>>, %arg7: memref<1x3x128xf32, #tpu.memory_space<vmem>>, %arg8: memref<1x16x3xf32, #tpu.memory_space<vmem>>, %arg9: memref<1x3x128xf32, #tpu.memory_space<vmem>>, %arg10: memref<1x16x256xbf16, #tpu.memory_space<vmem>>, %arg11: memref<1x16x256xbf16, #tpu.memory_space<vmem>>, %arg12: memref<1x2x16x128xf32, #tpu.memory_space<vmem>>, %arg13: memref<16x128xf32, #tpu.memory_space<vmem>>, %arg14: memref<16x128xf32, #tpu.memory_space<vmem>>, %arg15: memref<16x128xf32, #tpu.memory_space<vmem>>, %arg16: memref<16x128xf32, #tpu.memory_space<vmem>>) attributes {dimension_semantics = [#tpu.dimension_semantics<parallel>, #tpu.dimension_semantics<parallel>, #tpu.dimension_semantics<arbitrary>], iteration_bounds = array<i64: 2, 1, 1>, scalar_prefetch = 0 : i64, scratch_operands = 4 : i64, tpu.core_type = #tpu.core_type<tc>, window_params = [{transform_indices = @transform_0, window_bounds = array<i64: 1, 16, 5>}, {transform_indices = @transform_1, window_bounds = array<i64: 1, 5, 128>}, {transform_indices = @transform_2, window_bounds = array<i64: 1, 1, 128>}, {transform_indices = @transform_3, window_bounds = array<i64: 1, 16, 3>}, {transform_indices = @transform_4, window_bounds = array<i64: 1, 3, 128>}, {transform_indices = @transform_5, window_bounds = array<i64: 1, 16, 3>}, {transform_indices = @transform_6, window_bounds = array<i64: 1, 3, 128>}, {transform_indices = @transform_7, window_bounds = array<i64: 1, 16, 256>}, {transform_indices = @transform_8, window_bounds = array<i64: 1, 16, 256>}, {transform_indices = @transform_9, window_bounds = array<i64: 1, 2, 16, 128>}]} {
    %c0_i32 = arith.constant 0 : i32
    %0 = arith.cmpi eq, %arg2, %c0_i32 : i32
    %1 = arith.extui %0 : i1 to i32
    %c0_i32_0 = arith.constant 0 : i32
    %2 = arith.cmpi ne, %1, %c0_i32_0 : i32
    scf.if %2 {
      %cst_32 = arith.constant 0.000000e+00 : f32
      %63 = vector.broadcast %cst_32 : f32 to vector<16x128xf32>
      %c0_33 = arith.constant 0 : index
      %c0_34 = arith.constant 0 : index
      %64 = vector.load %arg13[%c0_33, %c0_34] : memref<16x128xf32, #tpu.memory_space<vmem>>, vector<16x128xf32>
      tpu.vector_store %arg13[%c0_33, %c0_34], %63 {strides = array<i32>} : memref<16x128xf32, #tpu.memory_space<vmem>>, vector<16x128xf32>,
      %cst_35 = arith.constant 0.000000e+00 : f32
      %65 = vector.broadcast %cst_35 : f32 to vector<16x128xf32>
      %c0_36 = arith.constant 0 : index
      %c0_37 = arith.constant 0 : index
      %66 = vector.load %arg14[%c0_36, %c0_37] : memref<16x128xf32, #tpu.memory_space<vmem>>, vector<16x128xf32>
      tpu.vector_store %arg14[%c0_36, %c0_37], %65 {strides = array<i32>} : memref<16x128xf32, #tpu.memory_space<vmem>>, vector<16x128xf32>,
      %cst_38 = arith.constant 0.000000e+00 : f32
      %67 = vector.broadcast %cst_38 : f32 to vector<16x128xf32>
      %c0_39 = arith.constant 0 : index
      %c0_40 = arith.constant 0 : index
      %68 = vector.load %arg15[%c0_39, %c0_40] : memref<16x128xf32, #tpu.memory_space<vmem>>, vector<16x128xf32>
      tpu.vector_store %arg15[%c0_39, %c0_40], %67 {strides = array<i32>} : memref<16x128xf32, #tpu.memory_space<vmem>>, vector<16x128xf32>,
      %cst_41 = arith.constant 0.000000e+00 : f32
      %69 = vector.broadcast %cst_41 : f32 to vector<16x128xf32>
      %c0_42 = arith.constant 0 : index
      %c0_43 = arith.constant 0 : index
      %70 = vector.load %arg16[%c0_42, %c0_43] : memref<16x128xf32, #tpu.memory_space<vmem>>, vector<16x128xf32>
      tpu.vector_store %arg16[%c0_42, %c0_43], %69 {strides = array<i32>} : memref<16x128xf32, #tpu.memory_space<vmem>>, vector<16x128xf32>,
    } else {
    }
    %c0 = arith.constant 0 : index
    %c0_1 = arith.constant 0 : index
    %c0_2 = arith.constant 0 : index
    %3 = vector.load %arg10[%c0, %c0_1, %c0_2] : memref<1x16x256xbf16, #tpu.memory_space<vmem>>, vector<1x16x256xbf16>
    %4 = vector.shape_cast %3 : vector<1x16x256xbf16> to vector<16x256xbf16>
    %5 = arith.extf %4 : vector<16x256xbf16> to vector<16x256xf32>
    %c0_3 = arith.constant 0 : index
    %c0_4 = arith.constant 0 : index
    %c0_5 = arith.constant 0 : index
    %6 = vector.load %arg11[%c0_3, %c0_4, %c0_5] : memref<1x16x256xbf16, #tpu.memory_space<vmem>>, vector<1x16x256xbf16>
    %7 = vector.shape_cast %6 : vector<1x16x256xbf16> to vector<16x256xbf16>
    %8 = math.absf %5 : vector<16x256xf32>
    %cst = arith.constant 0.000000e+00 : f32
    %9 = vector.broadcast %cst : f32 to vector<16x256xf32>
    %10 = arith.subf %9, %8 : vector<16x256xf32>
    %11 = math.exp %10 : vector<16x256xf32>
    %cst_6 = arith.constant 1.000000e+00 : f32
    %12 = vector.broadcast %cst_6 : f32 to vector<16x256xf32>
    %13 = arith.addf %12, %11 : vector<16x256xf32>
    %14 = tpu.reciprocal %13 {approx = true} : vector<16x256xf32> -> vector<16x256xf32>
    %cst_7 = arith.constant 0.000000e+00 : f32
    %15 = vector.broadcast %cst_7 : f32 to vector<16x256xf32>
    %16 = arith.cmpf oge, %5, %15 : vector<16x256xf32>
    %cst_8 = arith.constant 1.000000e+00 : f32
    %17 = vector.broadcast %cst_8 : f32 to vector<16x256xf32>
    %18 = arith.subf %17, %14 : vector<16x256xf32>
    %19 = arith.select %16, %14, %18 : vector<16x256xi1>, vector<16x256xf32>
    %cst_9 = arith.constant 0.000000e+00 : f32
    %20 = vector.broadcast %cst_9 : f32 to vector<16x256xf32>
    %21 = arith.maximumf %5, %20 : vector<16x256xf32>
    %22 = math.log %13 : vector<16x256xf32>
    %23 = arith.addf %21, %22 : vector<16x256xf32>
    %cst_10 = arith.constant 1.000000e+00 : f32
    %24 = vector.broadcast %cst_10 : f32 to vector<16x256xf32>
    %25 = arith.subf %24, %19 : vector<16x256xf32>
    %26 = arith.mulf %25, %25 : vector<16x256xf32>
    %27 = arith.mulf %19, %19 : vector<16x256xf32>
    %28 = arith.subf %23, %5 : vector<16x256xf32>
    %29 = arith.mulf %26, %28 : vector<16x256xf32>
    %30 = arith.mulf %27, %23 : vector<16x256xf32>
    %cst_11 = arith.constant 2.500000e-01 : f32
    %31 = vector.broadcast %cst_11 : f32 to vector<16x256xf32>
    %32 = arith.mulf %31, %29 : vector<16x256xf32>
    %cst_12 = arith.constant 7.500000e-01 : f32
    %33 = vector.broadcast %cst_12 : f32 to vector<16x256xf32>
    %34 = arith.mulf %33, %30 : vector<16x256xf32>
    %35 = arith.subf %32, %34 : vector<16x256xf32>
    %36 = arith.truncf %35 : vector<16x256xf32> to vector<16x256xbf16>
    %37 = arith.truncf %19 : vector<16x256xf32> to vector<16x256xbf16>
    %38 = tpu.concatenate %36, %37 in 0 : vector<16x256xbf16>, vector<16x256xbf16> -> vector<32x256xbf16>
    %cst_13 = arith.constant dense<0.000000e+00> : vector<32x16xf32>
    %39 = tpu.matmul %38, %7, %cst_13 {dimension_numbers = #tpu.dot_dimension_numbers<[1], [1], [0], [0], [0, 0, 1, 0], [], []>} : vector<32x256xbf16>, vector<16x256xbf16>, vector<32x16xf32> -> vector<32x16xf32>
    %c0_14 = arith.constant 0 : index
    %c0_15 = arith.constant 0 : index
    %40 = vector.load %arg13[%c0_14, %c0_15] : memref<16x128xf32, #tpu.memory_space<vmem>>, vector<16x16xf32>
    %41 = vector.extract_strided_slice %39 {offsets = [0, 0], sizes = [16, 16], strides = [1, 1]} : vector<32x16xf32> to vector<16x16xf32>
    %42 = arith.addf %40, %41 : vector<16x16xf32>
    %c0_16 = arith.constant 0 : index
    %c0_17 = arith.constant 0 : index
    %43 = vector.load %arg13[%c0_16, %c0_17] : memref<16x128xf32, #tpu.memory_space<vmem>>, vector<16x16xf32>
    tpu.vector_store %arg13[%c0_16, %c0_17], %42 {strides = array<i32>} : memref<16x128xf32, #tpu.memory_space<vmem>>, vector<16x16xf32>,
    %c0_18 = arith.constant 0 : index
    %c0_19 = arith.constant 0 : index
    %44 = vector.load %arg14[%c0_18, %c0_19] : memref<16x128xf32, #tpu.memory_space<vmem>>, vector<16x16xf32>
    %45 = vector.extract_strided_slice %39 {offsets = [16, 0], sizes = [16, 16], strides = [1, 1]} : vector<32x16xf32> to vector<16x16xf32>
    %46 = arith.addf %44, %45 : vector<16x16xf32>
    %c0_20 = arith.constant 0 : index
    %c0_21 = arith.constant 0 : index
    %47 = vector.load %arg14[%c0_20, %c0_21] : memref<16x128xf32, #tpu.memory_space<vmem>>, vector<16x16xf32>
    tpu.vector_store %arg14[%c0_20, %c0_21], %46 {strides = array<i32>} : memref<16x128xf32, #tpu.memory_space<vmem>>, vector<16x16xf32>,
    %48 = vector.extract_strided_slice %30 {offsets = [0, 0], sizes = [16, 128], strides = [1, 1]} : vector<16x256xf32> to vector<16x128xf32>
    %49 = vector.extract_strided_slice %19 {offsets = [0, 0], sizes = [16, 128], strides = [1, 1]} : vector<16x256xf32> to vector<16x128xf32>
    %50 = vector.extract_strided_slice %30 {offsets = [0, 128], sizes = [16, 128], strides = [1, 1]} : vector<16x256xf32> to vector<16x128xf32>
    %51 = arith.addf %48, %50 : vector<16x128xf32>
    %52 = vector.extract_strided_slice %19 {offsets = [0, 128], sizes = [16, 128], strides = [1, 1]} : vector<16x256xf32> to vector<16x128xf32>
    %53 = arith.addf %49, %52 : vector<16x128xf32>
    %c0_22 = arith.constant 0 : index
    %c0_23 = arith.constant 0 : index
    %54 = vector.load %arg15[%c0_22, %c0_23] : memref<16x128xf32, #tpu.memory_space<vmem>>, vector<16x128xf32>
    %55 = arith.addf %54, %51 : vector<16x128xf32>
    %c0_24 = arith.constant 0 : index
    %c0_25 = arith.constant 0 : index
    %56 = vector.load %arg15[%c0_24, %c0_25] : memref<16x128xf32, #tpu.memory_space<vmem>>, vector<16x128xf32>
    tpu.vector_store %arg15[%c0_24, %c0_25], %55 {strides = array<i32>} : memref<16x128xf32, #tpu.memory_space<vmem>>, vector<16x128xf32>,
    %c0_26 = arith.constant 0 : index
    %c0_27 = arith.constant 0 : index
    %57 = vector.load %arg16[%c0_26, %c0_27] : memref<16x128xf32, #tpu.memory_space<vmem>>, vector<16x128xf32>
    %58 = arith.addf %57, %53 : vector<16x128xf32>
    %c0_28 = arith.constant 0 : index
    %c0_29 = arith.constant 0 : index
    %59 = vector.load %arg16[%c0_28, %c0_29] : memref<16x128xf32, #tpu.memory_space<vmem>>, vector<16x128xf32>
    tpu.vector_store %arg16[%c0_28, %c0_29], %58 {strides = array<i32>} : memref<16x128xf32, #tpu.memory_space<vmem>>, vector<16x128xf32>,
    %c0_i32_30 = arith.constant 0 : i32
    %60 = arith.cmpi eq, %arg2, %c0_i32_30 : i32
    %61 = arith.extui %60 : i1 to i32
    %c0_i32_31 = arith.constant 0 : i32
    %62 = arith.cmpi ne, %61, %c0_i32_31 : i32
    scf.if %62 {
      %c0_32 = arith.constant 0 : index
      %c0_33 = arith.constant 0 : index
      %c0_34 = arith.constant 0 : index
      %63 = vector.load %arg3[%c0_32, %c0_33, %c0_34] : memref<1x16x5xf32, #tpu.memory_space<vmem>>, vector<1x16x5xf32>
      %64 = vector.shape_cast %63 : vector<1x16x5xf32> to vector<16x5xf32>
      %c0_35 = arith.constant 0 : index
      %c0_36 = arith.constant 0 : index
      %c0_37 = arith.constant 0 : index
      %65 = vector.load %arg4[%c0_35, %c0_36, %c0_37] : memref<1x5x128xf32, #tpu.memory_space<vmem>>, vector<1x5x128xf32>
      %66 = vector.shape_cast %65 : vector<1x5x128xf32> to vector<5x128xf32>
      %c0_38 = arith.constant 0 : index
      %c0_39 = arith.constant 0 : index
      %c0_40 = arith.constant 0 : index
      %67 = vector.load %arg5[%c0_38, %c0_39, %c0_40] : memref<1x1x128xf32, #tpu.memory_space<vmem>>, vector<1x1x128xf32>
      %68 = vector.shape_cast %67 : vector<1x1x128xf32> to vector<1x128xf32>
      %c0_41 = arith.constant 0 : index
      %c0_42 = arith.constant 0 : index
      %c0_43 = arith.constant 0 : index
      %69 = vector.load %arg6[%c0_41, %c0_42, %c0_43] : memref<1x16x3xf32, #tpu.memory_space<vmem>>, vector<1x16x3xf32>
      %70 = vector.shape_cast %69 : vector<1x16x3xf32> to vector<16x3xf32>
      %c0_44 = arith.constant 0 : index
      %c0_45 = arith.constant 0 : index
      %c0_46 = arith.constant 0 : index
      %71 = vector.load %arg7[%c0_44, %c0_45, %c0_46] : memref<1x3x128xf32, #tpu.memory_space<vmem>>, vector<1x3x128xf32>
      %72 = vector.shape_cast %71 : vector<1x3x128xf32> to vector<3x128xf32>
      %c0_47 = arith.constant 0 : index
      %c0_48 = arith.constant 0 : index
      %c0_49 = arith.constant 0 : index
      %73 = vector.load %arg8[%c0_47, %c0_48, %c0_49] : memref<1x16x3xf32, #tpu.memory_space<vmem>>, vector<1x16x3xf32>
      %74 = vector.shape_cast %73 : vector<1x16x3xf32> to vector<16x3xf32>
      %c0_50 = arith.constant 0 : index
      %c0_51 = arith.constant 0 : index
      %c0_52 = arith.constant 0 : index
      %75 = vector.load %arg9[%c0_50, %c0_51, %c0_52] : memref<1x3x128xf32, #tpu.memory_space<vmem>>, vector<1x3x128xf32>
      %76 = vector.shape_cast %75 : vector<1x3x128xf32> to vector<3x128xf32>
      %cst_53 = arith.constant dense<0xFF800000> : vector<16xf32>
      %77 = vector.multi_reduction <maximumf>, %64, %cst_53 [1] : vector<16x5xf32> to vector<16xf32>
      %78 = vector.shape_cast %77 : vector<16xf32> to vector<16x1xf32>
      %79 = vector.broadcast %78 : vector<16x1xf32> to vector<16x5xf32>
      %80 = arith.subf %64, %79 : vector<16x5xf32>
      %81 = math.exp %80 : vector<16x5xf32>
      %cst_54 = arith.constant dense<0.000000e+00> : vector<16xf32>
      %82 = vector.multi_reduction <add>, %81, %cst_54 [1] : vector<16x5xf32> to vector<16xf32>
      %83 = vector.shape_cast %82 : vector<16xf32> to vector<16x1xf32>
      %84 = vector.broadcast %83 : vector<16x1xf32> to vector<16x5xf32>
      %85 = arith.divf %81, %84 : vector<16x5xf32>
      %cst_55 = arith.constant 0.000000e+00 : f32
      %86 = vector.broadcast %cst_55 : f32 to vector<16x128xf32>
      %87 = vector.extract_strided_slice %85 {offsets = [0, 0], sizes = [16, 1], strides = [1, 1]} : vector<16x5xf32> to vector<16x1xf32>
      %88 = vector.extract_strided_slice %66 {offsets = [0, 0], sizes = [1, 128], strides = [1, 1]} : vector<5x128xf32> to vector<1x128xf32>
      %89 = vector.broadcast %87 : vector<16x1xf32> to vector<16x128xf32>
      %90 = vector.broadcast %88 : vector<1x128xf32> to vector<16x128xf32>
      %91 = arith.mulf %89, %90 : vector<16x128xf32>
      %92 = arith.subf %86, %91 : vector<16x128xf32>
      %93 = vector.extract_strided_slice %85 {offsets = [0, 1], sizes = [16, 1], strides = [1, 1]} : vector<16x5xf32> to vector<16x1xf32>
      %94 = vector.extract_strided_slice %66 {offsets = [1, 0], sizes = [1, 128], strides = [1, 1]} : vector<5x128xf32> to vector<1x128xf32>
      %95 = vector.broadcast %93 : vector<16x1xf32> to vector<16x128xf32>
      %96 = vector.broadcast %94 : vector<1x128xf32> to vector<16x128xf32>
      %97 = arith.mulf %95, %96 : vector<16x128xf32>
      %98 = arith.subf %92, %97 : vector<16x128xf32>
      %99 = vector.extract_strided_slice %85 {offsets = [0, 2], sizes = [16, 1], strides = [1, 1]} : vector<16x5xf32> to vector<16x1xf32>
      %100 = vector.extract_strided_slice %66 {offsets = [2, 0], sizes = [1, 128], strides = [1, 1]} : vector<5x128xf32> to vector<1x128xf32>
      %101 = vector.broadcast %99 : vector<16x1xf32> to vector<16x128xf32>
      %102 = vector.broadcast %100 : vector<1x128xf32> to vector<16x128xf32>
      %103 = arith.mulf %101, %102 : vector<16x128xf32>
      %104 = arith.subf %98, %103 : vector<16x128xf32>
      %105 = vector.extract_strided_slice %85 {offsets = [0, 3], sizes = [16, 1], strides = [1, 1]} : vector<16x5xf32> to vector<16x1xf32>
      %106 = vector.extract_strided_slice %66 {offsets = [3, 0], sizes = [1, 128], strides = [1, 1]} : vector<5x128xf32> to vector<1x128xf32>
      %107 = vector.broadcast %105 : vector<16x1xf32> to vector<16x128xf32>
      %108 = vector.broadcast %106 : vector<1x128xf32> to vector<16x128xf32>
      %109 = arith.mulf %107, %108 : vector<16x128xf32>
      %110 = arith.subf %104, %109 : vector<16x128xf32>
      %111 = vector.extract_strided_slice %85 {offsets = [0, 4], sizes = [16, 1], strides = [1, 1]} : vector<16x5xf32> to vector<16x1xf32>
      %112 = vector.extract_strided_slice %66 {offsets = [4, 0], sizes = [1, 128], strides = [1, 1]} : vector<5x128xf32> to vector<1x128xf32>
      %113 = vector.broadcast %111 : vector<16x1xf32> to vector<16x128xf32>
      %114 = vector.broadcast %112 : vector<1x128xf32> to vector<16x128xf32>
      %115 = arith.mulf %113, %114 : vector<16x128xf32>
      %116 = arith.subf %110, %115 : vector<16x128xf32>
      %c0_56 = arith.constant 0 : index
      %c0_57 = arith.constant 0 : index
      %117 = vector.load %arg15[%c0_56, %c0_57] : memref<16x128xf32, #tpu.memory_space<vmem>>, vector<16x128xf32>
      %cst_58 = arith.constant dense<0.000000e+00> : vector<16xf32>
      %118 = vector.multi_reduction <add>, %117, %cst_58 [1] : vector<16x128xf32> to vector<16xf32>
      %119 = vector.shape_cast %118 : vector<16xf32> to vector<16x1xf32>
      %cst_59 = arith.constant 7.500000e-01 : f32
      %120 = vector.broadcast %cst_59 : f32 to vector<16x1xf32>
      %121 = arith.mulf %120, %119 : vector<16x1xf32>
      %c0_60 = arith.constant 0 : index
      %c0_61 = arith.constant 0 : index
      %122 = vector.load %arg16[%c0_60, %c0_61] : memref<16x128xf32, #tpu.memory_space<vmem>>, vector<16x128xf32>
      %cst_62 = arith.constant dense<0.000000e+00> : vector<16xf32>
      %123 = vector.multi_reduction <add>, %122, %cst_62 [1] : vector<16x128xf32> to vector<16xf32>
      %124 = vector.shape_cast %123 : vector<16xf32> to vector<16x1xf32>
      %c0_63 = arith.constant 0 : index
      %c0_64 = arith.constant 0 : index
      %125 = vector.load %arg13[%c0_63, %c0_64] : memref<16x128xf32, #tpu.memory_space<vmem>>, vector<16x128xf32>
      %126 = vector.broadcast %121 : vector<16x1xf32> to vector<16x128xf32>
      %127 = arith.addf %125, %126 : vector<16x128xf32>
      %cst_65 = arith.constant 3.906250e-03 : f32
      %128 = vector.broadcast %cst_65 : f32 to vector<16x128xf32>
      %129 = arith.mulf %127, %128 : vector<16x128xf32>
      %c0_66 = arith.constant 0 : index
      %c0_67 = arith.constant 0 : index
      %130 = vector.load %arg14[%c0_66, %c0_67] : memref<16x128xf32, #tpu.memory_space<vmem>>, vector<16x128xf32>
      %cst_68 = arith.constant 2.000000e+00 : f32
      %131 = vector.broadcast %cst_68 : f32 to vector<16x128xf32>
      %132 = arith.mulf %131, %130 : vector<16x128xf32>
      %cst_69 = arith.constant 1.000000e+00 : f32
      %133 = vector.broadcast %cst_69 : f32 to vector<16x128xf32>
      %134 = arith.addf %132, %133 : vector<16x128xf32>
      %135 = vector.broadcast %124 : vector<16x1xf32> to vector<16x128xf32>
      %136 = vector.broadcast %68 : vector<1x128xf32> to vector<16x128xf32>
      %137 = arith.addf %135, %136 : vector<16x128xf32>
      %cst_70 = arith.constant 1.000000e+00 : f32
      %138 = vector.broadcast %cst_70 : f32 to vector<16x128xf32>
      %139 = arith.addf %137, %138 : vector<16x128xf32>
      %140 = arith.divf %134, %139 : vector<16x128xf32>
      %cst_71 = arith.constant 1.000000e+00 : f32
      %141 = vector.broadcast %cst_71 : f32 to vector<16x128xf32>
      %142 = arith.subf %141, %140 : vector<16x128xf32>
      %cst_72 = arith.constant 0.000000e+00 : f32
      %143 = vector.broadcast %cst_72 : f32 to vector<16x128xf32>
      %144 = vector.extract_strided_slice %70 {offsets = [0, 0], sizes = [16, 1], strides = [1, 1]} : vector<16x3xf32> to vector<16x1xf32>
      %145 = vector.extract_strided_slice %72 {offsets = [0, 0], sizes = [1, 128], strides = [1, 1]} : vector<3x128xf32> to vector<1x128xf32>
      %146 = vector.broadcast %144 : vector<16x1xf32> to vector<16x128xf32>
      %147 = vector.broadcast %145 : vector<1x128xf32> to vector<16x128xf32>
      %148 = arith.subf %146, %147 : vector<16x128xf32>
      %149 = arith.mulf %148, %148 : vector<16x128xf32>
      %150 = arith.addf %143, %149 : vector<16x128xf32>
      %151 = vector.extract_strided_slice %70 {offsets = [0, 1], sizes = [16, 1], strides = [1, 1]} : vector<16x3xf32> to vector<16x1xf32>
      %152 = vector.extract_strided_slice %72 {offsets = [1, 0], sizes = [1, 128], strides = [1, 1]} : vector<3x128xf32> to vector<1x128xf32>
      %153 = vector.broadcast %151 : vector<16x1xf32> to vector<16x128xf32>
      %154 = vector.broadcast %152 : vector<1x128xf32> to vector<16x128xf32>
      %155 = arith.subf %153, %154 : vector<16x128xf32>
      %156 = arith.mulf %155, %155 : vector<16x128xf32>
      %157 = arith.addf %150, %156 : vector<16x128xf32>
      %158 = vector.extract_strided_slice %70 {offsets = [0, 2], sizes = [16, 1], strides = [1, 1]} : vector<16x3xf32> to vector<16x1xf32>
      %159 = vector.extract_strided_slice %72 {offsets = [2, 0], sizes = [1, 128], strides = [1, 1]} : vector<3x128xf32> to vector<1x128xf32>
      %160 = vector.broadcast %158 : vector<16x1xf32> to vector<16x128xf32>
      %161 = vector.broadcast %159 : vector<1x128xf32> to vector<16x128xf32>
      %162 = arith.subf %160, %161 : vector<16x128xf32>
      %163 = arith.mulf %162, %162 : vector<16x128xf32>
      %164 = arith.addf %157, %163 : vector<16x128xf32>
      %165 = math.sqrt %164 : vector<16x128xf32>
      %cst_73 = arith.constant 0.000000e+00 : f32
      %166 = vector.broadcast %cst_73 : f32 to vector<16x128xf32>
      %cst_74 = arith.constant 0.000000e+00 : f32
      %167 = vector.broadcast %cst_74 : f32 to vector<16x1xf32>
      %cst_75 = arith.constant 0.000000e+00 : f32
      %168 = vector.broadcast %cst_75 : f32 to vector<1x128xf32>
      %169 = vector.extract_strided_slice %74 {offsets = [0, 0], sizes = [16, 1], strides = [1, 1]} : vector<16x3xf32> to vector<16x1xf32>
      %170 = vector.extract_strided_slice %76 {offsets = [0, 0], sizes = [1, 128], strides = [1, 1]} : vector<3x128xf32> to vector<1x128xf32>
      %171 = vector.broadcast %169 : vector<16x1xf32> to vector<16x128xf32>
      %172 = vector.broadcast %170 : vector<1x128xf32> to vector<16x128xf32>
      %173 = arith.subf %171, %172 : vector<16x128xf32>
      %174 = math.absf %173 : vector<16x128xf32>
      %175 = arith.addf %166, %174 : vector<16x128xf32>
      %176 = arith.mulf %169, %169 : vector<16x1xf32>
      %177 = arith.addf %167, %176 : vector<16x1xf32>
      %178 = arith.mulf %170, %170 : vector<1x128xf32>
      %179 = arith.addf %168, %178 : vector<1x128xf32>
      %180 = vector.extract_strided_slice %74 {offsets = [0, 1], sizes = [16, 1], strides = [1, 1]} : vector<16x3xf32> to vector<16x1xf32>
      %181 = vector.extract_strided_slice %76 {offsets = [1, 0], sizes = [1, 128], strides = [1, 1]} : vector<3x128xf32> to vector<1x128xf32>
      %182 = vector.broadcast %180 : vector<16x1xf32> to vector<16x128xf32>
      %183 = vector.broadcast %181 : vector<1x128xf32> to vector<16x128xf32>
      %184 = arith.subf %182, %183 : vector<16x128xf32>
      %185 = math.absf %184 : vector<16x128xf32>
      %186 = arith.addf %175, %185 : vector<16x128xf32>
      %187 = arith.mulf %180, %180 : vector<16x1xf32>
      %188 = arith.addf %177, %187 : vector<16x1xf32>
      %189 = arith.mulf %181, %181 : vector<1x128xf32>
      %190 = arith.addf %179, %189 : vector<1x128xf32>
      %191 = vector.extract_strided_slice %74 {offsets = [0, 2], sizes = [16, 1], strides = [1, 1]} : vector<16x3xf32> to vector<16x1xf32>
      %192 = vector.extract_strided_slice %76 {offsets = [2, 0], sizes = [1, 128], strides = [1, 1]} : vector<3x128xf32> to vector<1x128xf32>
      %193 = vector.broadcast %191 : vector<16x1xf32> to vector<16x128xf32>
      %194 = vector.broadcast %192 : vector<1x128xf32> to vector<16x128xf32>
      %195 = arith.subf %193, %194 : vector<16x128xf32>
      %196 = math.absf %195 : vector<16x128xf32>
      %197 = arith.addf %186, %196 : vector<16x128xf32>
      %198 = arith.mulf %191, %191 : vector<16x1xf32>
      %199 = arith.addf %188, %198 : vector<16x1xf32>
      %200 = arith.mulf %192, %192 : vector<1x128xf32>
      %201 = arith.addf %190, %200 : vector<1x128xf32>
      %202 = math.sqrt %199 : vector<16x1xf32>
      %203 = math.sqrt %201 : vector<1x128xf32>
      %204 = vector.broadcast %202 : vector<16x1xf32> to vector<16x128xf32>
      %205 = vector.broadcast %203 : vector<1x128xf32> to vector<16x128xf32>
      %206 = arith.subf %204, %205 : vector<16x128xf32>
      %207 = math.absf %206 : vector<16x128xf32>
      %cst_76 = arith.constant 9.99999996E-13 : f32
      %208 = vector.broadcast %cst_76 : f32 to vector<16x1xf32>
      %209 = arith.maximumf %202, %208 : vector<16x1xf32>
      %cst_77 = arith.constant 1.000000e+00 : f32
      %210 = vector.broadcast %cst_77 : f32 to vector<16x1xf32>
      %211 = arith.divf %210, %209 : vector<16x1xf32>
      %cst_78 = arith.constant 9.99999996E-13 : f32
      %212 = vector.broadcast %cst_78 : f32 to vector<1x128xf32>
      %213 = arith.maximumf %203, %212 : vector<1x128xf32>
      %cst_79 = arith.constant 1.000000e+00 : f32
      %214 = vector.broadcast %cst_79 : f32 to vector<1x128xf32>
      %215 = arith.divf %214, %213 : vector<1x128xf32>
      %cst_80 = arith.constant 0.000000e+00 : f32
      %216 = vector.broadcast %cst_80 : f32 to vector<16x128xf32>
      %217 = vector.extract_strided_slice %74 {offsets = [0, 0], sizes = [16, 1], strides = [1, 1]} : vector<16x3xf32> to vector<16x1xf32>
      %218 = arith.mulf %217, %211 : vector<16x1xf32>
      %219 = vector.extract_strided_slice %76 {offsets = [0, 0], sizes = [1, 128], strides = [1, 1]} : vector<3x128xf32> to vector<1x128xf32>
      %220 = arith.mulf %219, %215 : vector<1x128xf32>
      %221 = vector.broadcast %218 : vector<16x1xf32> to vector<16x128xf32>
      %222 = vector.broadcast %220 : vector<1x128xf32> to vector<16x128xf32>
      %223 = arith.mulf %221, %222 : vector<16x128xf32>
      %224 = arith.addf %216, %223 : vector<16x128xf32>
      %225 = vector.extract_strided_slice %74 {offsets = [0, 1], sizes = [16, 1], strides = [1, 1]} : vector<16x3xf32> to vector<16x1xf32>
      %226 = arith.mulf %225, %211 : vector<16x1xf32>
      %227 = vector.extract_strided_slice %76 {offsets = [1, 0], sizes = [1, 128], strides = [1, 1]} : vector<3x128xf32> to vector<1x128xf32>
      %228 = arith.mulf %227, %215 : vector<1x128xf32>
      %229 = vector.broadcast %226 : vector<16x1xf32> to vector<16x128xf32>
      %230 = vector.broadcast %228 : vector<1x128xf32> to vector<16x128xf32>
      %231 = arith.mulf %229, %230 : vector<16x128xf32>
      %232 = arith.addf %224, %231 : vector<16x128xf32>
      %233 = vector.extract_strided_slice %74 {offsets = [0, 2], sizes = [16, 1], strides = [1, 1]} : vector<16x3xf32> to vector<16x1xf32>
      %234 = arith.mulf %233, %211 : vector<16x1xf32>
      %235 = vector.extract_strided_slice %76 {offsets = [2, 0], sizes = [1, 128], strides = [1, 1]} : vector<3x128xf32> to vector<1x128xf32>
      %236 = arith.mulf %235, %215 : vector<1x128xf32>
      %237 = vector.broadcast %234 : vector<16x1xf32> to vector<16x128xf32>
      %238 = vector.broadcast %236 : vector<1x128xf32> to vector<16x128xf32>
      %239 = arith.mulf %237, %238 : vector<16x128xf32>
      %240 = arith.addf %232, %239 : vector<16x128xf32>
      %cst_81 = arith.constant -0.999998986 : f32
      %cst_82 = arith.constant 0.999998986 : f32
      %241 = vector.broadcast %cst_81 : f32 to vector<16x128xf32>
      %242 = arith.maximumf %241, %240 : vector<16x128xf32>
      %243 = vector.broadcast %cst_82 : f32 to vector<16x128xf32>
      %244 = arith.minimumf %243, %242 : vector<16x128xf32>
      %cst_83 = arith.constant 2.000000e+01 : f32
      %245 = vector.broadcast %cst_83 : f32 to vector<16x128xf32>
      %246 = arith.mulf %245, %129 : vector<16x128xf32>
      %cst_84 = arith.constant 1.000000e+00 : f32
      %247 = vector.broadcast %cst_84 : f32 to vector<16x128xf32>
      %248 = arith.mulf %247, %116 : vector<16x128xf32>
      %249 = arith.addf %246, %248 : vector<16x128xf32>
      %cst_85 = arith.constant 1.000000e+00 : f32
      %250 = vector.broadcast %cst_85 : f32 to vector<16x128xf32>
      %251 = arith.mulf %250, %142 : vector<16x128xf32>
      %252 = arith.addf %249, %251 : vector<16x128xf32>
      %cst_86 = arith.constant 5.000000e-01 : f32
      %253 = vector.broadcast %cst_86 : f32 to vector<16x128xf32>
      %254 = arith.mulf %253, %165 : vector<16x128xf32>
      %255 = arith.addf %252, %254 : vector<16x128xf32>
      %cst_87 = arith.constant 1.000000e+00 : f32
      %256 = vector.broadcast %cst_87 : f32 to vector<16x128xf32>
      %257 = arith.mulf %256, %197 : vector<16x128xf32>
      %258 = arith.addf %255, %257 : vector<16x128xf32>
      %cst_88 = arith.constant 0.00999999977 : f32
      %259 = vector.broadcast %cst_88 : f32 to vector<16x128xf32>
      %260 = arith.mulf %259, %207 : vector<16x128xf32>
      %261 = arith.addf %258, %260 : vector<16x128xf32>
      %c0_89 = arith.constant 0 : index
      %c0_90 = arith.constant 0 : index
      %c0_91 = arith.constant 0 : index
      %c0_92 = arith.constant 0 : index
      %262 = vector.load %arg12[%c0_89, %c0_90, %c0_91, %c0_92] : memref<1x2x16x128xf32, #tpu.memory_space<vmem>>, vector<1x1x16x128xf32>
      %263 = vector.shape_cast %262 : vector<1x1x16x128xf32> to vector<16x128xf32>
      %264 = vector.shape_cast %261 : vector<16x128xf32> to vector<1x1x16x128xf32>
      tpu.vector_store %arg12[%c0_89, %c0_90, %c0_91, %c0_92], %264 {strides = array<i32>} : memref<1x2x16x128xf32, #tpu.memory_space<vmem>>, vector<1x1x16x128xf32>,
      %c0_93 = arith.constant 0 : index
      %c1 = arith.constant 1 : index
      %c0_94 = arith.constant 0 : index
      %c0_95 = arith.constant 0 : index
      %265 = vector.load %arg12[%c0_93, %c1, %c0_94, %c0_95] : memref<1x2x16x128xf32, #tpu.memory_space<vmem>>, vector<1x1x16x128xf32>
      %266 = vector.shape_cast %265 : vector<1x1x16x128xf32> to vector<16x128xf32>
      %267 = vector.shape_cast %244 : vector<16x128xf32> to vector<1x1x16x128xf32>
      tpu.vector_store %arg12[%c0_93, %c1, %c0_94, %c0_95], %267 {strides = array<i32>} : memref<1x2x16x128xf32, #tpu.memory_space<vmem>>, vector<1x1x16x128xf32>,
    } else {
    }
    return
  }
  func.func @transform_0(%arg0: i32, %arg1: i32, %arg2: i32) -> (i32, i32, i32) {
    %c0_i32 = arith.constant 0 : i32
    %c0_i32_0 = arith.constant 0 : i32
    return %arg0, %arg1, %c0_i32 : i32, i32, i32
  }
  func.func @transform_1(%arg0: i32, %arg1: i32, %arg2: i32) -> (i32, i32, i32) {
    %c0_i32 = arith.constant 0 : i32
    %c0_i32_0 = arith.constant 0 : i32
    %c0_i32_1 = arith.constant 0 : i32
    return %arg0, %c0_i32, %c0_i32_0 : i32, i32, i32
  }
  func.func @transform_2(%arg0: i32, %arg1: i32, %arg2: i32) -> (i32, i32, i32) {
    %c0_i32 = arith.constant 0 : i32
    %c0_i32_0 = arith.constant 0 : i32
    %c0_i32_1 = arith.constant 0 : i32
    return %arg0, %c0_i32, %c0_i32_0 : i32, i32, i32
  }
  func.func @transform_3(%arg0: i32, %arg1: i32, %arg2: i32) -> (i32, i32, i32) {
    %c0_i32 = arith.constant 0 : i32
    %c0_i32_0 = arith.constant 0 : i32
    return %arg0, %arg1, %c0_i32 : i32, i32, i32
  }
  func.func @transform_4(%arg0: i32, %arg1: i32, %arg2: i32) -> (i32, i32, i32) {
    %c0_i32 = arith.constant 0 : i32
    %c0_i32_0 = arith.constant 0 : i32
    %c0_i32_1 = arith.constant 0 : i32
    return %arg0, %c0_i32, %c0_i32_0 : i32, i32, i32
  }
  func.func @transform_5(%arg0: i32, %arg1: i32, %arg2: i32) -> (i32, i32, i32) {
    %c0_i32 = arith.constant 0 : i32
    %c0_i32_0 = arith.constant 0 : i32
    return %arg0, %arg1, %c0_i32 : i32, i32, i32
  }
  func.func @transform_6(%arg0: i32, %arg1: i32, %arg2: i32) -> (i32, i32, i32) {
    %c0_i32 = arith.constant 0 : i32
    %c0_i32_0 = arith.constant 0 : i32
    %c0_i32_1 = arith.constant 0 : i32
    return %arg0, %c0_i32, %c0_i32_0 : i32, i32, i32
  }
  func.func @transform_7(%arg0: i32, %arg1: i32, %arg2: i32) -> (i32, i32, i32) {
    %c0_i32 = arith.constant 0 : i32
    return %arg0, %arg1, %arg2 : i32, i32, i32
  }
  func.func @transform_8(%arg0: i32, %arg1: i32, %arg2: i32) -> (i32, i32, i32) {
    %c0_i32 = arith.constant 0 : i32
    %c0_i32_0 = arith.constant 0 : i32
    return %arg0, %c0_i32, %arg2 : i32, i32, i32
  }
  func.func @transform_9(%arg0: i32, %arg1: i32, %arg2: i32) -> (i32, i32, i32, i32) {
    %c0_i32 = arith.constant 0 : i32
    %c0_i32_0 = arith.constant 0 : i32
    %c0_i32_1 = arith.constant 0 : i32
    return %arg0, %c0_i32, %arg1, %c0_i32_0 : i32, i32, i32, i32
  }
}

</mosaic_0001>

<bundles_post_ra>
// kernel: tpu_custom_call.1
= control target key start
LH: loop header
LB: loop body
LE: loop exit
PB: predicated region body
PF: predicated region fallthrough
CT: control target
= control target key end

     0   :  { %14 = vsyncpa [#allocation7], 0  ;;  %s2369_s0 = inlined_call_operand.vmem [shape: f32[2,16,5], index: 0, kind: input, shape index: {}]   ;;  %s2370_s1 = inlined_call_operand.vmem [shape: f32[2,5,128], index: 1, kind: input, shape index: {}]   ;;  %s2371_s2 = inlined_call_operand.vmem [shape: f32[2,1,128], index: 2, kind: input, shape index: {}]   ;;  %s2372_s3 = inlined_call_operand.vmem [shape: f32[2,16,3], index: 3, kind: input, shape index: {}]   ;;  %s2373_s4 = inlined_call_operand.vmem [shape: f32[2,3,128], index: 4, kind: input, shape index: {}]   ;;  %s2374_s5 = inlined_call_operand.vmem [shape: f32[2,16,3], index: 5, kind: input, shape index: {}]   ;;  %s2375_s6 = inlined_call_operand.vmem [shape: f32[2,3,128], index: 6, kind: input, shape index: {}]   ;;  %s2376_s7 = inlined_call_operand.vmem [shape: bf16[2,16,256], index: 7, kind: input, shape index: {}]   ;;  %s2377_s8 = inlined_call_operand.vmem [shape: bf16[2,16,256], index: 8, kind: input, shape index: {}]   ;;  %s2378_s9 = inlined_call_operand.hbm [shape: f32[2,2,16,128], index: 9, kind: output, shape index: {}]  }
   0x1   :  { %16 = vsyncpa [#allocation7 + $0x1], 0  ;;  %s1902_s30 = smov 0   ;;  %s1904_s10 = smov 0  }
   0x2   :  { %s1906_s11 = smov 0   ;;  %s1908_s12 = smov 0  }
   0x3   :  { %s1910_s13 = smov 0   ;;  %s1912_s14 = smov 0  }
   0x4 LB: > { %2381 = sst [smem:[#allocation9_spill]] %s1834_s13  ;;  %s1570_s15 = sadd.s32 4294967295, %s1838_s14   ;;  %s1838_s14 = sphi %s1912_s14, %s22_s14   ;;  %s1834_s13 = sphi %s1910_s13, %s2396_s13   ;;  %s1830_s12 = sphi %s1908_s12, %s2395_s12   ;;  %s1826_s11 = sphi %s1906_s11, %s2399_s11   ;;  %s1822_s10 = sphi %s1904_s10, %s2398_s10   ;;  %s1818_s30 = sphi %s1902_s30, %s2397_s30  }
   0x5   : > { %s1571_s16 = sadd.s32 4294967294, %s1838_s14   ;;  %s41_s17 = sadd.s32 1, %s1834_s13 }
   0x6   : > { %s296_s18 = sadd.s32 1, %s1826_s11  ;;  %p43_p0 = scmp.ge.s32.totalorder %s41_s17, 2 }
   0x7   : > { %p306_p1 = scmp.ne.s32.totalorder %s1826_s11, %s1822_s10  ;;  %p307_p2 = scmp.eq.s32.totalorder %s1570_s15, 1 }
   0x8   : > { %p312_p3 = scmp.ne.s32.totalorder %s1822_s10, %s1818_s30  ;;  %s2401_s17 = smov (%p43_p0, %s41_s17), 0 }
   0x9   : > { %2382 = sst [smem:[#allocation10_spill]] %s2401_s17  ;;  %p1942_p4 = por %p307_p2, %p306_p1 }
   0xa   : > { %p313_p5 = scmp.eq.s32.totalorder %s1571_s16, 1  ;;  %s291_s20 = ssub.s32 %s1834_s13, %s2401_s17 }
   0xb   : > { %p1574_p6 = scmp.ge.s32.totalorder %s1838_s14, 1  ;;  %p294_p7 = scmp.eq.s32.totalorder %s291_s20, 0 }
   0xc   : > { %p1949_p8 = por %p313_p5, %p312_p3  ;;  %p429_p9 = scmp.lt.s32.totalorder %s1838_s14, 3 }
   0xd   : > { %s1955_s22 = scalar_select %p294_p7, %s1826_s11, %s296_s18  }
   0xe   : > { %p430_p10 = pnand %p1574_p6, %p429_p9 }
   0xf   : > { %2385 = sst [smem:[#allocation11_spill]] %s1955_s22  ;;  %p526_p11 = scmp.lt.s32.totalorder (!%p430_p10), %s1830_s12, 1 }
  0x10   : > { %433 = sbr.rel (%p430_p10) target bundleno = 480 (0x1e0), region = 56  ;;  %s1840_s13 = smov (!%p430_p10), 127  }
  0x11   : > { %s1841_s17 = smov (!%p430_p10), 126  }
  0x15   : > { %s1959_s23 = scalar_select %p526_p11, %s1830_s12, 1  ;;  %vm820_vm0 = vcmask 39936   ;;  %v1842_v39 = vmov 0   ;;  %vm782_vm11 = vcmask 130048  }
  0x16   : > { %1683 = vset.pattern.permute.xlu1 %v1842_v39  ;;  %1684 = vset.pattern.permute.xlu2 %v1842_v39 }
  0x17   : > { %s1962_s24 = sshll.u32 %s1959_s23, 4  ;;  %s541_s26 = scalar_lea.vmem %s2371_s2, %s1959_s23 }
  0x18   : > { %s533_s27 = scalar_lea.vmem %s2369_s0, %s1962_s24  ;;  %s1972_s15 = scalar_lea.vmem %s2374_s5, %s1962_s24 }
  0x19   : > { %s583_s20 = scalar_lea.vmem %s2376_s7, %s1962_s24  ;;  %v1978_v0 = vld [vmem:[%s533_s27] sm:$0xff]  ;;  %v1981_v1 = vld [vmem:[%s1972_s15 + $0x8] sm:$0xff]  ;;  %s594_s22 = scalar_lea.vmem %s2377_s8, %s1962_s24 }
  0x1a   : > { %v610_v2 = vld [vmem:[%s583_s20] sm:$0xff]  ;;  %v611_v3 = vld [vmem:[%s583_s20 + $0x8] sm:$0xff]  ;;  %v821_v4 = vsel %vm820_vm0, %v1978_v0, -inf  ;;  %v1991_v5 = vmul.f32 %v1981_v1, %v1981_v1  ;;  %s550_s29 = scalar_lea.vmem %s2372_s3, %s1962_s24  ;;  %s1846_s24 = smov 1  }
  0x1b   : > { %v1993_v6 = vunpack.c.l.bf16 %v610_v2  ;;  %v1995_v7 = vunpack.c.h.bf16 %v610_v2  ;;  %v1997_v8 = vunpack.c.l.bf16 %v611_v3  ;;  %v1999_v9 = vunpack.c.h.bf16 %v611_v3  ;;  %822 = vmax.xlane.f32.xlu0 %v821_v4  ;;  %v1591_v10 = vld [vmem:[%s594_s22] sm:$0xf]  ;;  %v1612_v11 = vld [vmem:[%s594_s22 + $0x4] sm:$0xf0]  ;;  %v1611_v12 = vld [vmem:[%s594_s22 + $0x4] sm:$0xf] }
  0x1c   : > { %v2001_v13 = vld [vmem:[%s533_s27 + $0x8] sm:$0xff]  ;;  %1114 = vrot.lane.b32.xlu2 %v1991_v5, %s1840_s13  ;;  %v1592_v14 = vor.u32 %v1612_v11, %v1591_v10  ;;  %v2014_v38 = vld [vmem:[%s1972_s15] sm:$0xff]  ;;  %s1581_s15 = sshll.u32 %s1959_s23, 2 }
  0x1d   : > { %v1593_v15 = vld [vmem:[%s594_s22 + $0x8] sm:$0xf0]  ;;  %v618_v16 = vand.u32 2147483647, %v1993_v6  ;;  %v619_v17 = vand.u32 2147483647, %v1995_v7  ;;  %v2021_v42 = vmul.f32 %v2014_v38, %v2014_v38  ;;  %s555_s20 = scalar_lea.vmem %s2373_s4, %s1581_s15  ;;  %s569_s25 = scalar_lea.vmem %s2375_s6, %s1581_s15 }
  0x1e   : > { %v620_v18 = vand.u32 2147483647, %v1997_v8  ;;  %v1596_v19 = vor.u32 %v1611_v12, %v1593_v15  ;;  %v621_v20 = vand.u32 2147483647, %v1999_v9  ;;  %1614 = vmatpush.bf16.xpose.msra.mxu2 %v1592_v14  ;;  %747 = vmatpush.bf16.xpose.msra.mxu0 %v1592_v14  ;;  %v824_v25 = vsel %vm820_vm0, %v2001_v13, -inf }
  0x1f   : > { %v622_v21 = vsub.f32 0.0, %v618_v16  ;;  %v623_v22 = vsub.f32 0.0, %v619_v17  ;;  %vm642_vm1 = vcmp.ge.f32.partialorder %v1993_v6, 0.0  ;;  %vm643_vm2 = vcmp.ge.f32.partialorder %v1995_v7, 0.0 }
  0x20   : > { %v624_v23 = vsub.f32 0.0, %v620_v18  ;;  %1615 = vmatpush.bf16.xpose.msra.mxu3 %v1596_v19  ;;  %766 = vmatpush.bf16.xpose.msra.mxu1 %v1596_v19  ;;  %v625_v24 = vsub.f32 0.0, %v621_v20  ;;  %vm644_vm3 = vcmp.ge.f32.partialorder %v1997_v8, 0.0  ;;  %vm645_vm4 = vcmp.ge.f32.partialorder %v1999_v9, 0.0 }
  0x21   : > { %v626_v26 = vmul.f32 1.442695, %v622_v21  ;;  %v628_v27 = vmul.f32 1.442695, %v623_v22  ;;  %v654_v46 = vmax.f32 %v1993_v6, 0.0  ;;  %v655_v50 = vmax.f32 %v1995_v7, 0.0 }
  0x22   : > { %v630_v28 = vmul.f32 1.442695, %v624_v23  ;;  %v632_v29 = vmul.f32 1.442695, %v625_v24  ;;  %v656_v51 = vmax.f32 %v1997_v8, 0.0  ;;  %v657_v18 = vmax.f32 %v1999_v9, 0.0 }
  0x23   : > { %825 = vmax.xlane.f32.xlu0 %v824_v25  ;;  %1708 = vpow2.f32 %v626_v26 }
  0x24   : > { %1141 = vrot.lane.b32.xlu2 %v1991_v5, %s1841_s17  ;;  %1710 = vpow2.f32 %v628_v27 }
  0x25   : > { %1712 = vpow2.f32 %v630_v28 }
  0x26   : > { %1714 = vpow2.f32 %v632_v29 }
  0x29   : > { %v1709_v30 = vpop.eup %1708 }
  0x2a   : > { %v1711_v31 = vpop.eup %1710  ;;  %v634_v32 = vadd.f32 1.0, %v1709_v30 }
  0x2b   : > { %v1713_v33 = vpop.eup %1712  ;;  %v635_v34 = vadd.f32 1.0, %v1711_v31 }
  0x2c   : > { %v1715_v35 = vpop.eup %1714  ;;  %v636_v36 = vadd.f32 1.0, %v1713_v33  ;;  %1716 = vrcp.f32 %v634_v32 }
  0x2d   : > { %v637_v37 = vadd.f32 1.0, %v1715_v35  ;;  %1718 = vrcp.f32 %v635_v34 }
  0x2e   : > { %1720 = vrcp.f32 %v636_v36 }
  0x2f   : > { %1722 = vrcp.f32 %v637_v37 }
  0x30   : > { %1724 = vlog2.f32 %v634_v32 }
  0x31   : > { %1726 = vlog2.f32 %v635_v34 }
  0x32   : > { %v1717_v40 = vpop.eup %1716  ;;  %1728 = vlog2.f32 %v636_v36 }
  0x33   : > { %v1719_v41 = vpop.eup %1718  ;;  %v646_v43 = vsub.f32 1.0, %v1717_v40  ;;  %1730 = vlog2.f32 %v637_v37 }
  0x34   : > { %v1721_v44 = vpop.eup %1720  ;;  %v647_v45 = vsub.f32 1.0, %v1719_v41 }
  0x35   : > { %v1723_v47 = vpop.eup %1722  ;;  %v648_v48 = vsub.f32 1.0, %v1721_v44  ;;  %v2027_v49 = vsel %vm642_vm1, %v1717_v40, %v646_v43 }
  0x36   : > { %v1725_v52 = vpop.eup %1724  ;;  %v649_v53 = vsub.f32 1.0, %v1723_v47  ;;  %v2031_v54 = vsel %vm643_vm2, %v1719_v41, %v647_v45  ;;  %v678_v55 = vmul.f32 %v2027_v49, %v2027_v49  ;;  %v670_v56 = vsub.f32 1.0, %v2027_v49 }
  0x37   : > { %v1727_v57 = vpop.eup %1726  ;;  %1112 = vrot.lane.b32.xlu0 %v2021_v42, %s1840_s13  ;;  %v652_v58 = vsel %vm644_vm3, %v1721_v44, %v648_v48  ;;  %v708_v59 = vpack.c.bf16 %v2031_v54, %v2027_v49  ;;  %v659_v60 = vmul.f32 0.6931472, %v1725_v52  ;;  %v671_v61 = vsub.f32 1.0, %v2031_v54  ;;  %s1847_s13 = smov 2  }
  0x38   : > { %v1729_v62 = vpop.eup %1728  ;;  %v653_v63 = vsel %vm645_vm4, %v1723_v47, %v649_v53  ;;  %v661_v2 = vmul.f32 0.6931472, %v1727_v57  ;;  %v679_v3 = vmul.f32 %v2031_v54, %v2031_v54  ;;  %v674_v4 = vmul.f32 %v670_v56, %v670_v56 }
  0x39   : > { %v1731_v10 = vpop.eup %1730  ;;  %v709_v11 = vpack.c.bf16 %v653_v63, %v652_v58  ;;  %v722_v12 = vunpack.c.l.b16 %v708_v59  ;;  %v723_v14 = vunpack.c.h.b16 %v708_v59  ;;  %v666_v15 = vadd.f32 %v659_v60, %v654_v46 }
  0x3a   : > { %v667_v16 = vadd.f32 %v661_v2, %v655_v50  ;;  %v675_v17 = vmul.f32 %v671_v61, %v671_v61  ;;  %v663_v19 = vmul.f32 0.6931472, %v1729_v62  ;;  %v665_v26 = vmul.f32 0.6931472, %v1731_v10 }
  0x3b   : > { %v724_v20 = vunpack.c.l.b16 %v709_v11  ;;  %v725_v21 = vunpack.c.h.b16 %v709_v11  ;;  %v682_v22 = vsub.f32 %v666_v15, %v1993_v6  ;;  %v690_v23 = vmul.f32 %v678_v55, %v666_v15 }
  0x3c   : > { %v683_v24 = vsub.f32 %v667_v16, %v1995_v7  ;;  %v691_v25 = vmul.f32 %v679_v3, %v667_v16  ;;  %v668_v27 = vadd.f32 %v663_v19, %v656_v51  ;;  %v669_v35 = vadd.f32 %v665_v26, %v657_v18 }
  0x3d   : > { %v726_v28 = vpack.c.b16 %v724_v20, %v722_v12  ;;  %v727_v29 = vpack.c.b16 %v725_v21, %v723_v14  ;;  %v686_v30 = vmul.f32 %v682_v22, %v674_v4  ;;  %v698_v31 = vmul.f32 0.75, %v690_v23 }
  0x3e   : > { %v687_v32 = vmul.f32 %v683_v24, %v675_v17  ;;  %v699_v33 = vmul.f32 0.75, %v691_v25  ;;  %v791_v34 = vadd.f32 %v691_v25, %v690_v23  ;;  %v672_v36 = vsub.f32 1.0, %v652_v58 }
  0x3f   : > { %753 = vmatmul.bf16.vlgmr.msra.gmra.mxu2 %v726_v28  ;;  %772 = vmatmul.bf16.vlgmr.msra.gmra.mxu3 %v727_v29  ;;  %v694_v6 = vmul.f32 0.25, %v686_v30  ;;  %v673_v7 = vsub.f32 1.0, %v653_v63  ;;  %v680_v37 = vmul.f32 %v652_v58, %v652_v58  ;;  %v681_v41 = vmul.f32 %v653_v63, %v653_v63 }
  0x40   : > { %v695_v40 = vmul.f32 0.25, %v687_v32  ;;  %938 = vadd.xlane.f32.xlu1 %v791_v34  ;;  %1139 = vrot.lane.b32.xlu0 %v2021_v42, %s1841_s17  ;;  %v684_v43 = vsub.f32 %v668_v27, %v1997_v8  ;;  %v685_v44 = vsub.f32 %v669_v35, %v1999_v9  ;;  %v676_v46 = vmul.f32 %v672_v36, %v672_v36 }
  0x41   : > { %v702_v45 = vsub.f32 %v694_v6, %v698_v31  ;;  %v677_v47 = vmul.f32 %v673_v7, %v673_v7  ;;  %v692_v48 = vmul.f32 %v680_v37, %v668_v27  ;;  %v693_v51 = vmul.f32 %v681_v41, %v669_v35 }
  0x42   : > { %v703_v50 = vsub.f32 %v695_v40, %v699_v33  ;;  %v688_v52 = vmul.f32 %v684_v43, %v676_v46  ;;  %v1843_v56 = vmov 1   ;;  %v794_v57 = vadd.f32 %v653_v63, %v652_v58  ;;  %v814_v58 = vld [vmem:[%s550_s29] sm:$0xff]  ;;  %v815_v63 = vld [vmem:[%s550_s29 + $0x8] sm:$0xff] }
  0x43   : > { %v689_v53 = vmul.f32 %v685_v44, %v677_v47  ;;  %v700_v55 = vmul.f32 0.75, %v692_v48  ;;  %1685 = vset.pattern.permute.xlu0 %v1843_v56  ;;  %v701_v59 = vmul.f32 0.75, %v693_v51  ;;  %v793_v10 = vadd.f32 %v2031_v54, %v2027_v49 }
  0x44   : > { %v696_v60 = vmul.f32 0.25, %v688_v52  ;;  %v706_v8 = vpack.c.bf16 %v703_v50, %v702_v45  ;;  %v792_v16 = vadd.f32 %v693_v51, %v692_v48  ;;  %v1844_v49 = vmov 2  }
  0x45   : > { %v697_v61 = vmul.f32 0.25, %v689_v53 }
  0x46   : > { %v704_v62 = vsub.f32 %v696_v60, %v700_v55  ;;  %v712_v3 = vunpack.c.l.b16 %v706_v8  ;;  %v713_v4 = vunpack.c.h.b16 %v706_v8 }
  0x47   : > { %v705_v9 = vsub.f32 %v697_v61, %v701_v59 }
  0x48   : > { %948 = vadd.xlane.f32.xlu1 %v794_v57 }
  0x49   : > { %v707_v2 = vpack.c.bf16 %v705_v9, %v704_v62 }
  0x4b   : > { %v714_v11 = vunpack.c.l.b16 %v707_v2  ;;  %v715_v12 = vunpack.c.h.b16 %v707_v2 }
  0x4d   : > { %v716_v14 = vpack.c.b16 %v714_v11, %v712_v3  ;;  %v717_v15 = vpack.c.b16 %v715_v12, %v713_v4  ;;  %946 = vadd.xlane.f32.xlu2 %v793_v10 }
  0x4f   : > { %748 = vmatmul.bf16.vlgmr.msra.gmra.mxu0 %v716_v14  ;;  %767 = vmatmul.bf16.vlgmr.msra.gmra.mxu1 %v717_v15 }
  0x61   : > { %1003 = vperm.xlu1 %1683, %v814_v58  }
  0x65   : > { %1008 = vperm.xlu2 %1684, %v815_v63  }
  0x69   : > { %1686 = vset.pattern.permute.xlu1 %v1843_v56 }
  0x6a   : > { %1023 = vperm.xlu1 %1686, %v815_v63   ;;  %940 = vadd.xlane.f32.xlu0 %v792_v16 }
  0x6d   : > { %1688 = vset.pattern.permute.xlu2 %v1844_v49 }
  0x6e   : > { %1038 = vperm.xlu2 %1688, %v815_v63  }
  0x72   : > { %1687 = vset.pattern.permute.xlu1 %v1844_v49 }
  0x73   : > { %1034 = vperm.xlu1 %1687, %v814_v58  }
  0x76   : > { %1691 = vset.pattern.permute.xlu2 %v1843_v56  ;;  %v1115_v54 = vpop.permute.xlu2 %1114 }
  0x77   : > { %1096 = vperm.xlu2 %1691, %v2014_v38   ;;  %v1119_v17 = vadd.f32 %v1115_v54, %v1991_v5 }
  0x7b   : > { %1689 = vset.pattern.permute.xlu1 %v1842_v39 }
  0x7c   : > { %1074 = vperm.xlu1 %1689, %v2014_v38  }
  0x7e   : > { %1019 = vperm.xlu0 %1685, %v814_v58   ;;  %v1142_v18 = vpop.permute.xlu2 %1141 }
  0x7f   : > { %1693 = vset.pattern.permute.xlu2 %v1844_v49  ;;  %v1146_v19 = vadd.f32 %v1142_v18, %v1119_v17 }
  0x80   : > { %1125 = vperm.xlu2 %1693, %v2014_v38  }
  0x81   : > { %1732 = vrsqrt.f32 %v1146_v19  ;;  %vm1169_vm5 = vcmp.eq.f32.partialorder %v1146_v19, inf  ;;  %v1172_v29 = vand.u32 2147483648, %v1146_v19  ;;  %vm1171_vm6 = vcmp.eq.f32.partialorder %v1146_v19, 0.0 }
  0x84   : > { %1692 = vset.pattern.permute.xlu1 %v1843_v56 }
  0x85   : > { %1100 = vperm.xlu1 %1692, %v1981_v1  }
  0x86   : > { %1690 = vset.pattern.permute.xlu0 %v1842_v39 }
  0x87   : > { %1079 = vperm.xlu0 %1690, %v1981_v1   ;;  %v1733_v5 = vpop.eup %1732 }
  0x88   : > { %1695 = vset.pattern.permute.xlu2 %v1842_v39  ;;  %v1163_v20 = vmul.f32 %v1733_v5, %v1146_v19 }
  0x8a   : > { %v1164_v21 = vmul.f32 %v1733_v5, %v1163_v20 }
  0x8c   : > { %v1165_v22 = vmul.f32 0.5, %v1164_v21  ;;  %v816_v21 = vld [vmem:[%s555_s20] sm:$0x7]  ;;  %s1613_s20 = sshll.u32 %s1830_s12, 5 }
  0x8d   : > { %1694 = vset.pattern.permute.xlu1 %v1844_v49  ;;  %s1361_s22 = scalar_lea.hbm %s2378_s9, %s1613_s20 }
  0x8e   : > { %v823_v23 = vpop.xlane.xlu0 %822  ;;  %v1166_v24 = vsub.f32 1.5, %v1165_v22  ;;  %s1364_s27 = sshll.u32 %s1361_s22, 4  ;;  %s1365_s27 = int_to_ptr.hbm [resolvable:$true] %s1364_s27 }
  0x8f   : > { %v827_v26 = vsub.f32 %v1978_v0, %v823_v23  ;;  %v1845_v0 = vmov 0.0   ;;  %s1774_s28 = sshra.s32 %s1365_s27, 4  ;;  %s1775_s28 = int_to_ptr.hbm [resolvable:$true] %s1774_s28 }
  0x90   : > { %v1167_v25 = vmul.f32 %v1733_v5, %v1166_v24  ;;  %604 = vst [vmem:[#allocation3] sm:$0xff] %v1845_v0  ;;  %p1781_p1 = scmp.lt.s32.totalorder %s1775_s28, %s2378_s9 }
  0x91   : > { %v829_v31 = vmul.f32 1.442695, %v827_v26  ;;  %602 = vst [vmem:[#allocation2] sm:$0xff] %v1845_v0 }
  0x92   : > { %v1168_v27 = vmul.f32 %v1167_v25, %v1146_v19  ;;  %603 = vst [vmem:[#allocation2 + $0x8] sm:$0xff] %v1845_v0  ;;  %v1011_v25 = vperm.slane %v816_v21, 0 }
  0x93   : > { %605 = vst [vmem:[#allocation3 + $0x8] sm:$0xff] %v1845_v0 }
  0x94   : > { %v1170_v30 = vsel %vm1169_vm5, %v1146_v19, %v1168_v27  ;;  %v1041_v27 = vperm.slane %v816_v21, 2 }
  0x95   : > { %v1173_v32 = vsel %vm1171_vm6, %v1172_v29, %v1170_v30 }
  0x96   : > { %v826_v28 = vpop.xlane.xlu0 %825  ;;  %v1202_v33 = vmax.f32 %v1173_v32, 1e-12 }
  0x97   : > { %v828_v34 = vsub.f32 %v2001_v13, %v826_v28 }
  0x98   : > { %1734 = vrcp.f32 %v1202_v33  ;;  %v1229_v44 = vand.u32 2147483648, %v1202_v33  ;;  %vm1223_vm7 = vweird.f32 %v1202_v33  ;;  %v1227_v46 = vand.u32 2147483647, %v1202_v33 }
  0x99   : > { %1736 = vpow2.f32 %v829_v31  ;;  %v831_v35 = vmul.f32 1.442695, %v828_v34 }
  0x9a   : > { %v1230_v48 = vor.u32 1.1754944e-38, %v1229_v44  ;;  %vm1228_vm10 = vcmp.eq.f32.partialorder %v1227_v46, 8.507059e+37  ;;  %v2119_v46 = vld [vmem:[%s569_s25] sm:$0x7] }
  0x9b   : > { %1738 = vpow2.f32 %v831_v35 }
  0x9e   : > { %v1735_v36 = vpop.eup %1734 }
  0x9f   : > { %v2083_v7 = vpop.eup %1736  ;;  %v1219_v37 = vmul.f32 %v1735_v36, %v1202_v33  ;;  %vm1224_vm8 = vweird.f32 %v1735_v36 }
  0xa0   : > { %v833_v41 = vsel %vm820_vm0, %v2083_v7, 0.0  ;;  %vm1225_vm9 = vmor %vm1223_vm7, %vm1224_vm8 }
  0xa1   : > { %v1220_v40 = vsub.f32 1.0, %v1219_v37  ;;  %v2088_v50 = vpop.eup %1738 }
  0xa3   : > { %v1221_v13 = vmul.f32 %v1735_v36, %v1220_v40 }
  0xa5   : > { %v1222_v45 = vadd.f32 %v1735_v36, %v1221_v13 }
  0xa7   : > { %v1226_v52 = vsel %vm1225_vm9, %v1735_v36, %v1222_v45 }
  0xa8   : > { %v2090_v53 = vsel %vm1228_vm10, %v1230_v48, %v1226_v52  ;;  %v1132_v52 = vperm.slane %v2119_v46, 2 }
  0xa9   : > { %v1113_v6 = vpop.permute.xlu0 %1112  ;;  %1271 = vrot.lane.b32.xlu2 %v2090_v53, %s1846_s24 }
  0xaa   : > { %v1118_v43 = vadd.f32 %v1113_v6, %v2021_v42  ;;  %v836_v42 = vsel %vm820_vm0, %v2088_v50, 0.0 }
  0xaf   : > { %834 = vadd.xlane.f32.xlu1 %v833_v41 }
  0xb1   : > { %1193 = vperm.xlu2 %1695, %v1173_v32   ;;  %v1026_v32 = vperm.slane %v816_v21, 1 }
  0xb2   : > { %v1140_v47 = vpop.permute.xlu0 %1139 }
  0xb3   : > { %v1145_v51 = vadd.f32 %v1140_v47, %v1118_v43  ;;  %v2096_v61 = vpop.xlane.xlu1 %938 }
  0xb5   : > { %1740 = vrsqrt.f32 %v1145_v51  ;;  %vm1157_vm12 = vcmp.eq.f32.partialorder %v1145_v51, inf  ;;  %v1160_v11 = vand.u32 2147483648, %v1145_v51  ;;  %vm1159_vm13 = vcmp.eq.f32.partialorder %v1145_v51, 0.0 }
  0xb7   : > { %837 = vadd.xlane.f32.xlu1 %v836_v42 }
  0xbb   : > { %v1741_v55 = vpop.eup %1740  ;;  %v2101_v16 = vpop.xlane.xlu1 %948 }
  0xbc   : > { %v1151_v57 = vmul.f32 %v1741_v55, %v1145_v51 }
  0xbe   : > { %v1152_v59 = vmul.f32 %v1741_v55, %v1151_v57  ;;  %v1082_v57 = vperm.slane %v2119_v46, 0 }
  0xc0   : > { %v1153_v60 = vmul.f32 0.5, %v1152_v59  ;;  %v2098_v3 = vpop.xlane.xlu2 %946 }
  0xc2   : > { %v1154_v8 = vsub.f32 1.5, %v1153_v60  ;;  %v754_v62 = vpop.f32.mrf.mxu2  ;;  %v773_v9 = vpop.f32.mrf.mxu3 }
  0xc3   : > { %v774_v2 = vadd.f32 %v773_v9, %v754_v62 }
  0xc4   : > { %v1155_v4 = vmul.f32 %v1741_v55, %v1154_v8 }
  0xc5   : > { %789 = vst.msk [vmem:[#allocation3] sm:$0xff] %vm782_vm11, %v774_v2 }
  0xc6   : > { %v1156_v10 = vmul.f32 %v1155_v4, %v1145_v51 }
  0xc8   : > { %v1158_v12 = vsel %vm1157_vm12, %v1145_v51, %v1156_v10  ;;  %v1009_v5 = vpop.permute.xlu2 %1008  ;;  %v1103_v51 = vperm.slane %v2119_v46, 1 }
  0xc9   : > { %v1161_v14 = vsel %vm1159_vm13, %v1160_v11, %v1158_v12  ;;  %v1013_v31 = vsub.f32 %v1009_v5, %v1011_v25 }
  0xca   : > { %v756_v15 = vpop.f32.mrf.mxu2  ;;  %v775_v58 = vpop.f32.mrf.mxu3  ;;  %v1201_v63 = vmax.f32 %v1161_v14, 1e-12 }
  0xcb   : > { %v776_v54 = vadd.f32 %v775_v58, %v756_v15  ;;  %v1015_v0 = vmul.f32 %v1013_v31, %v1013_v31 }
  0xcc   : > { %v749_v17 = vpop.f32.mrf.mxu0  ;;  %v768_v18 = vpop.f32.mrf.mxu1  ;;  %1742 = vrcp.f32 %v1201_v63  ;;  %v1214_v26 = vand.u32 2147483648, %v1201_v63  ;;  %v1212_v29 = vand.u32 2147483647, %v1201_v63  ;;  %vm1208_vm15 = vweird.f32 %v1201_v63 }
  0xcd   : > { %v769_v19 = vadd.f32 %v768_v18, %v749_v17  ;;  %790 = vst.msk [vmem:[#allocation3 + $0x8] sm:$0xff] %vm782_vm11, %v776_v54  ;;  %v1250_v17 = vmul.f32 %v2090_v53, %v1981_v1 }
  0xce   : > { %v1215_v34 = vor.u32 1.1754944e-38, %v1214_v26  ;;  %vm1213_vm1 = vcmp.eq.f32.partialorder %v1212_v29, 8.507059e+37 }
  0xcf   : > { %783 = vst.msk [vmem:[#allocation2] sm:$0xff] %vm782_vm11, %v769_v19 }
  0xd0   : > { %v1039_v30 = vpop.permute.xlu2 %1038 }
  0xd1   : > { %v1043_v35 = vsub.f32 %v1039_v30, %v1041_v27 }
  0xd2   : > { %v1743_v20 = vpop.eup %1742 }
  0xd3   : > { %v1004_v22 = vpop.permute.xlu1 %1003  ;;  %v1204_v23 = vmul.f32 %v1743_v20, %v1201_v63  ;;  %vm1209_vm14 = vweird.f32 %v1743_v20  ;;  %v1045_v43 = vmul.f32 %v1043_v35, %v1043_v35 }
  0xd4   : > { %vm1210_vm0 = vmor %vm1208_vm15, %vm1209_vm14  ;;  %v1012_v62 = vsub.f32 %v1004_v22, %v1011_v25  ;;  %v770_v21 = vpop.f32.mrf.mxu1 }
  0xd5   : > { %v1205_v24 = vsub.f32 1.0, %v1204_v23 }
  0xd6   : > { %v1014_v58 = vmul.f32 %v1012_v62, %v1012_v62 }
  0xd7   : > { %v1206_v28 = vmul.f32 %v1743_v20, %v1205_v24 }
  0xd8   : > { %v1097_v13 = vpop.permute.xlu2 %1096 }
  0xd9   : > { %v1207_v33 = vadd.f32 %v1743_v20, %v1206_v28  ;;  %v1104_v55 = vsub.f32 %v1097_v13, %v1103_v51 }
  0xdb   : > { %v1211_v6 = vsel %vm1210_vm0, %v1743_v20, %v1207_v33  ;;  %v1106_v9 = vand.u32 2147483647, %v1104_v55  ;;  %v751_v20 = vpop.f32.mrf.mxu0 }
  0xdc   : > { %v1024_v36 = vpop.permute.xlu1 %1023  ;;  %v1216_v37 = vsel %vm1213_vm1, %v1215_v34, %v1211_v6  ;;  %v771_v22 = vadd.f32 %v770_v21, %v751_v20 }
  0xdd   : > { %v1028_v40 = vsub.f32 %v1024_v36, %v1026_v32  ;;  %1296 = vrot.lane.b32.xlu1 %v1216_v37, %s1847_s13  ;;  %1269 = vrot.lane.b32.xlu0 %v1216_v37, %s1846_s24  ;;  %v2123_v48 = vpop.xlane.xlu0 %940  ;;  %v1249_v59 = vmul.f32 %v1216_v37, %v2014_v38 }
  0xde   : > { %784 = vst.msk [vmem:[#allocation2 + $0x8] sm:$0xff] %vm782_vm11, %v771_v22 }
  0xdf   : > { %v1030_v41 = vmul.f32 %v1028_v40, %v1028_v40 }
  0xe0   : > { %v1126_v42 = vpop.permute.xlu2 %1125 }
  0xe1   : > { %v1032_v44 = vadd.f32 %v1030_v41, %v1015_v0  ;;  %v1133_v60 = vsub.f32 %v1126_v42, %v1132_v52 }
  0xe3   : > { %v2117_v45 = vadd.f32 %v1045_v43, %v1032_v44  ;;  %v1135_v12 = vand.u32 2147483647, %v1133_v60  ;;  %v1849_v60 = vmov 3  }
  0xe5   : > { %v1035_v47 = vpop.permute.xlu1 %1034  ;;  %1129 = vperm.xlu1 %1694, %v1981_v1   ;;  %1298 = vrot.lane.b32.xlu0 %v2090_v53, %s1847_s13 }
  0xe6   : > { %v1042_v10 = vsub.f32 %v1035_v47, %v1041_v27 }
  0xed   : > { %1696 = vset.pattern.permute.xlu1 %v1842_v39  ;;  %1188 = vperm.xlu0 %1690, %v1161_v14   ;;  %v1044_v39 = vmul.f32 %v1042_v10, %v1042_v10 }
  0xee   : > { %v1075_v8 = vpop.permute.xlu1 %1074  ;;  %1254 = vperm.xlu1 %1696, %v1249_v59  }
  0xef   : > { %v1083_v2 = vsub.f32 %v1075_v8, %v1082_v57 }
  0xf0   : > { %v1020_v4 = vpop.permute.xlu0 %1019 }
  0xf1   : > { %v1085_v11 = vand.u32 2147483647, %v1083_v2  ;;  %v1027_v15 = vsub.f32 %v1020_v4, %v1026_v32 }
  0xf3   : > { %v1108_v63 = vadd.f32 %v1106_v9, %v1085_v11  ;;  %v1029_v54 = vmul.f32 %v1027_v15, %v1027_v15  ;;  %v1093_v9 = vmul.f32 %v2119_v46, %v2119_v46 }
  0xf5   : > { %v2138_v14 = vadd.f32 %v1135_v12, %v1108_v63  ;;  %v1031_v18 = vadd.f32 %v1029_v54, %v1014_v58  ;;  %1259 = vperm.xlu0 %1690, %v1250_v17   ;;  %v1121_v4 = vrot.slane %v1093_v9, 1  ;;  %v1147_v11 = vrot.slane %v1093_v9, 2 }
  0xf6   : > { %1698 = vset.pattern.permute.xlu1 %v1843_v56 }
  0xf7   : > { %v2141_v19 = vadd.f32 %v1044_v39, %v1031_v18  ;;  %v2144_v5 = vpop.permute.xlu1 %1100  ;;  %v1123_v10 = vadd.f32 %v1121_v4, %v1093_v9 }
  0xf9   : > { %v2154_v8 = vpop.permute.xlu0 %1079  ;;  %v1149_v15 = vadd.f32 %v1147_v11, %v1123_v10  ;;  %v956_v11 = vld [vmem:[#allocation3] sm:$0xff] }
  0xfb   : > { %vm1181_vm10 = vcmp.eq.f32.partialorder %v1149_v15, inf  ;;  %vm1183_vm11 = vcmp.eq.f32.partialorder %v1149_v15, 0.0 }
  0xfd   : > { %1697 = vset.pattern.permute.xlu0 %v1843_v56 }
 0x103   : > { %v1272_v42 = vpop.permute.xlu2 %1271 }
 0x104   : > { %v1276_v55 = vmul.f32 %v1272_v42, %v1981_v1  ;;  %v942_v42 = vmul.f32 0.75, %v2096_v61 }
 0x10b   : > { %v2162_v17 = vpop.permute.xlu2 %1193 }
 0x122   : > { %v835_v23 = vpop.xlane.xlu1 %834 }
 0x123   : > { %1744 = vrcp.f32 %v835_v23  ;;  %v850_v27 = vand.u32 2147483648, %v835_v23  ;;  %v848_v29 = vand.u32 2147483647, %v835_v23  ;;  %vm844_vm3 = vweird.f32 %v835_v23 }
 0x125   : > { %v851_v32 = vor.u32 1.1754944e-38, %v850_v27  ;;  %vm849_vm5 = vcmp.eq.f32.partialorder %v848_v29, 8.507059e+37 }
 0x129   : > { %v1745_v53 = vpop.eup %1744 }
 0x12a   : > { %v840_v24 = vmul.f32 %v1745_v53, %v835_v23  ;;  %v838_v25 = vpop.xlane.xlu1 %837  ;;  %vm845_vm2 = vweird.f32 %v1745_v53 }
 0x12b   : > { %1746 = vrcp.f32 %v838_v25  ;;  %vm846_vm4 = vmor %vm844_vm3, %vm845_vm2  ;;  %v865_v37 = vand.u32 2147483648, %v838_v25  ;;  %v863_v40 = vand.u32 2147483647, %v838_v25  ;;  %vm859_vm7 = vweird.f32 %v838_v25 }
 0x12c   : > { %v841_v26 = vsub.f32 1.0, %v840_v24  ;;  %1748 = vrsqrt.f32 %v1149_v15 }
 0x12d   : > { %v866_v43 = vor.u32 1.1754944e-38, %v865_v37  ;;  %vm864_vm9 = vcmp.eq.f32.partialorder %v863_v40, 8.507059e+37  ;;  %1750 = vrsqrt.f32 %v2141_v19 }
 0x12e   : > { %v842_v28 = vmul.f32 %v1745_v53, %v841_v26 }
 0x130   : > { %v843_v30 = vadd.f32 %v1745_v53, %v842_v28 }
 0x131   : > { %v1747_v31 = vpop.eup %1746 }
 0x132   : > { %v847_v33 = vsel %vm846_vm4, %v1745_v53, %v843_v30  ;;  %v855_v34 = vmul.f32 %v1747_v31, %v838_v25  ;;  %vm860_vm6 = vweird.f32 %v1747_v31  ;;  %v1749_v63 = vpop.eup %1748  ;;  %vm1055_vm4 = vcmp.eq.f32.partialorder %v2141_v19, inf }
 0x133   : > { %v852_v35 = vsel %vm849_vm5, %v851_v32, %v847_v33  ;;  %vm861_vm8 = vmor %vm859_vm7, %vm860_vm6  ;;  %v1175_v54 = vmul.f32 %v1749_v63, %v1149_v15  ;;  %vm1057_vm7 = vcmp.eq.f32.partialorder %v2141_v19, 0.0 }
 0x134   : > { %v856_v6 = vsub.f32 1.0, %v855_v34  ;;  %v853_v36 = vmul.f32 %v2083_v7, %v852_v35  ;;  %v1848_v7 = vmov 4  }
 0x136   : > { %v857_v0 = vmul.f32 %v1747_v31, %v856_v6  ;;  %871 = vperm.xlu2 %1695, %v853_v36   ;;  %885 = vperm.xlu0 %1697, %v853_v36  }
 0x138   : > { %v858_v41 = vadd.f32 %v1747_v31, %v857_v0 }
 0x13a   : > { %v862_v13 = vsel %vm861_vm8, %v1747_v31, %v858_v41 }
 0x13b   : > { %v867_v44 = vsel %vm864_vm9, %v866_v43, %v862_v13 }
 0x13c   : > { %v868_v47 = vmul.f32 %v2088_v50, %v867_v44 }
 0x13e   : > { %876 = vperm.xlu2 %1695, %v868_v47   ;;  %889 = vperm.xlu1 %1698, %v868_v47  }
 0x13f   : > { %1705 = vset.pattern.permute.xlu0 %v1844_v49 }
 0x146   : > { %1699 = vset.pattern.permute.xlu2 %v1844_v49  ;;  %1701 = vset.pattern.permute.xlu1 %v1848_v7 }
 0x147   : > { %898 = vperm.xlu2 %1699, %v853_v36   ;;  %924 = vperm.xlu1 %1701, %v853_v36  }
 0x14f   : > { %902 = vperm.xlu2 %1699, %v868_v47   ;;  %1704 = vset.pattern.permute.xlu1 %v1843_v56  ;;  %v1297_v59 = vpop.permute.xlu1 %1296  ;;  %v1270_v62 = vpop.permute.xlu0 %1269 }
 0x150   : > { %1288 = vperm.xlu1 %1704, %v1276_v55   ;;  %v1302_v50 = vmul.f32 %v1297_v59, %v2014_v38  ;;  %v1275_v2 = vmul.f32 %v1270_v62, %v2014_v38  ;;  %v1176_v38 = vmul.f32 %v1749_v63, %v1175_v54 }
 0x152   : > { %1309 = vperm.xlu0 %1705, %v1302_v50   ;;  %v1177_v39 = vmul.f32 0.5, %v1176_v38 }
 0x154   : > { %v1178_v21 = vsub.f32 1.5, %v1177_v39 }
 0x156   : > { %v1179_v22 = vmul.f32 %v1749_v63, %v1178_v21 }
 0x157   : > { %1700 = vset.pattern.permute.xlu2 %v1849_v60  ;;  %v1299_v12 = vpop.permute.xlu0 %1298  ;;  %v2182_v27 = vpop.permute.xlu1 %1129 }
 0x158   : > { %911 = vperm.xlu2 %1700, %v853_v36   ;;  %v1303_v58 = vmul.f32 %v1299_v12, %v1981_v1  ;;  %v1180_v24 = vmul.f32 %v1179_v22, %v1149_v15 }
 0x15a   : > { %v1182_v26 = vsel %vm1181_vm10, %v1149_v15, %v1180_v24  ;;  %vm1067_vm10 = vcmp.eq.f32.partialorder %v2117_v45, inf }
 0x15f   : > { %v2179_v25 = vpop.permute.xlu0 %1188 }
 0x160   : > { %915 = vperm.xlu2 %1700, %v868_v47   ;;  %v2212_v41 = vpop.permute.xlu1 %1254 }
 0x167   : > { %v2205_v36 = vpop.permute.xlu0 %1259 }
 0x168   : > { %1702 = vset.pattern.permute.xlu2 %v1848_v7  ;;  %v950_v7 = vld [vmem:[#allocation2] sm:$0xff] }
 0x169   : > { %928 = vperm.xlu2 %1702, %v868_v47   ;;  %v952_v4 = vadd.f32 %v950_v7, %v942_v42  ;;  %v1105_v42 = vsub.f32 %v2144_v5, %v1103_v51 }
 0x16b   : > { %v954_v21 = vmul.f32 0.00390625, %v952_v4 }
 0x171   : > { %1703 = vset.pattern.permute.xlu2 %v1843_v56  ;;  %v1707_v56 = vld [vmem:[%s541_s26] ss:$0 sm:$0xff]  ;;  %s1578_s26 = sshll.u32 %s1959_s23, 3  ;;  %s522_s23 = sand.u32 1, %s1822_s10  }
 0x172   : > { %1283 = vperm.xlu2 %1703, %v1275_v2   ;;  %v965_v20 = vadd.f32 %v1707_v56, %v2098_v3  ;;  %v966_v1 = vadd.f32 %v1707_v56, %v2101_v16  ;;  %v1751_v3 = vpop.eup %1750  ;;  %v1184_v16 = vand.u32 2147483648, %v1149_v15  ;;  %s538_s15 = scalar_lea.vmem %s2370_s1, %s1578_s26  ;;  %s1575_s16 = sshll.u32 %s522_s23, 5 }
 0x173   : > { %v1049_v29 = vmul.f32 %v1751_v3, %v2141_v19  ;;  %v2208_v0 = vld [vmem:[%s538_s15] sm:$0x1f]  ;;  %s2322_s18 = scalar_lea.vmem [#allocation6], %s1575_s16  ;;  %s1348_s12 = scalar_lea.sflag [#allocation7], %s522_s23 }
 0x174   : > { %v2174_v23 = vadd.f32 1.0, %v966_v1  ;;  %v2187_v30 = vsel %vm1183_vm11, %v1184_v16, %v1182_v26  ;;  %v879_v47 = vperm.slane %v2208_v0, 0  ;;  %v892_v60 = vperm.slane %v2208_v0, 1  ;;  %s1362_s25 = sshll.u32 %s2322_s18, 4  ;;  %s1776_s26 = scalar_lea.hbm %s1775_s28, 32  ;;  %s1363_s25 = int_to_ptr.vmem [resolvable:$true] %s1362_s25 }
 0x175   : > { %v2196_v33 = vmax.f32 %v2187_v30, 1e-12  ;;  %v1050_v35 = vmul.f32 %v1751_v3, %v1049_v29  ;;  %v958_v1 = vmul.f32 2.0, %v956_v11  ;;  %v905_v26 = vperm.slane %v2208_v0, 2  ;;  %p1777_p12 = scmp.ne.s32.totalorder %s1775_s28, %s1776_s26  ;;  %s1780_s15 = scalar_lea.hbm %s2378_s9, 64 }
 0x176   : > { %vm989_vm14 = vweird.f32 %v2174_v23  ;;  %v995_v54 = vand.u32 2147483648, %v2174_v23  ;;  %v918_v29 = vperm.slane %v2208_v0, 3  ;;  %vm1069_vm11 = vcmp.eq.f32.partialorder %v2117_v45, 0.0  ;;  %p1782_p2 = scmp.lt.s32.totalorder %s1780_s15, %s1776_s26 }
 0x177   : > { %v1051_v43 = vmul.f32 0.5, %v1050_v35  ;;  %vm1239_vm5 = vweird.f32 %v2196_v33  ;;  %p1778_p13 = pnand %p1777_p12, %p1942_p4 }
 0x178   : > { %p1783_p3 = por %p1782_p2, %p1781_p1 }
 0x179   : > { %v1052_v62 = vsub.f32 1.5, %v1051_v43  ;;  %p1779_p0 = pneg %p1778_p13 }
 0x17a   : > { %1706 = vset.pattern.permute.xlu2 %v1844_v49  ;;  %v2171_v49 = vadd.f32 1.0, %v965_v20  ;;  %v993_v20 = vand.u32 2147483647, %v2174_v23 }
 0x17b   : > { %1314 = vperm.xlu2 %1706, %v1303_v58   ;;  %p1784_p5 = pnand %p1783_p3, %p1779_p0 }
 0x17c   : > { %1752 = vrcp.f32 %v2171_v49  ;;  %vm974_vm12 = vweird.f32 %v2171_v49  ;;  %v980_v61 = vand.u32 2147483648, %v2171_v49  ;;  %v978_v58 = vand.u32 2147483647, %v2171_v49 }
 0x17d   : > { %1754 = vrcp.f32 %v2174_v23  ;;  %vm2256_vm3 = vcmp.eq.f32.partialorder %v993_v20, 8.507059e+37  ;;  %v1243_v20 = vand.u32 2147483647, %v2196_v33 }
 0x17e   : > { %1756 = vrsqrt.f32 %v2117_v45  ;;  %v981_v24 = vor.u32 1.1754944e-38, %v980_v61  ;;  %vm979_vm1 = vcmp.eq.f32.partialorder %v978_v58, 8.507059e+37  ;;  %v943_v61 = vmul.f32 0.75, %v2123_v48 }
 0x17f   : > { %1758 = vrcp.f32 %v2196_v33  ;;  %v1196_v58 = vperm.slane %v2187_v30, 0  ;;  %v951_v30 = vld [vmem:[#allocation2 + $0x8] sm:$0xff]  ;;  %vm1244_vm9 = vcmp.eq.f32.partialorder %v1243_v20, 8.507059e+37 }
 0x182   : > { %v2184_v28 = vpop.eup %1752 }
 0x183   : > { %v2192_v32 = vpop.eup %1754  ;;  %v970_v34 = vmul.f32 %v2184_v28, %v2171_v49  ;;  %vm975_vm13 = vweird.f32 %v2184_v28 }
 0x184   : > { %v985_v6 = vmul.f32 %v2192_v32, %v2174_v23  ;;  %v2210_v40 = vpop.eup %1756  ;;  %vm2237_vm15 = vmor %vm974_vm12, %vm975_vm13  ;;  %vm990_vm0 = vweird.f32 %v2192_v32 }
 0x185   : > { %v971_v37 = vsub.f32 1.0, %v970_v34  ;;  %v1061_v59 = vmul.f32 %v2210_v40, %v2117_v45  ;;  %v2221_v50 = vpop.eup %1758  ;;  %v957_v34 = vld [vmem:[#allocation3 + $0x8] sm:$0xff]  ;;  %vm2252_vm2 = vmor %vm989_vm14, %vm990_vm0 }
 0x186   : > { %v986_v13 = vsub.f32 1.0, %v985_v6  ;;  %v1235_v12 = vmul.f32 %v2221_v50, %v2196_v33  ;;  %vm1240_vm6 = vweird.f32 %v2221_v50 }
 0x187   : > { %v972_v55 = vmul.f32 %v2184_v28, %v971_v37  ;;  %v1062_v63 = vmul.f32 %v2210_v40, %v1061_v59  ;;  %v996_v37 = vor.u32 1.1754944e-38, %v995_v54  ;;  %v1326_v59 = vmul.f32 20.0, %v954_v21  ;;  %vm2286_vm8 = vmor %vm1239_vm5, %vm1240_vm6 }
 0x188   : > { %v987_v9 = vmul.f32 %v2192_v32, %v986_v13  ;;  %v1236_v35 = vsub.f32 1.0, %v1235_v12  ;;  %v1245_v54 = vand.u32 2147483648, %v2196_v33 }
 0x189   : > { %v973_v15 = vadd.f32 %v2184_v28, %v972_v55  ;;  %v1063_v6 = vmul.f32 0.5, %v1062_v63  ;;  %v960_v55 = vadd.f32 1.0, %v958_v1  ;;  %v1197_v1 = vsub.f32 %v2179_v25, %v1196_v58 }
 0x18a   : > { %v988_v22 = vadd.f32 %v2192_v32, %v987_v9 }
 0x18b   : > { %v1064_v11 = vsub.f32 1.5, %v1063_v6 }
 0x18d   : > { %v1065_v21 = vmul.f32 %v2210_v40, %v1064_v11  ;;  %v1070_v11 = vand.u32 2147483648, %v2117_v45 }
 0x18f   : > { %v1066_v6 = vmul.f32 %v1065_v21, %v2117_v45 }
 0x190   : > { %v872_v18 = vpop.permute.xlu2 %871 }
 0x191   : > { %v880_v10 = vmul.f32 %v879_v47, %v872_v18  ;;  %v1053_v18 = vmul.f32 %v1751_v3, %v1052_v62  ;;  %v977_v3 = vsel %vm2237_vm15, %v2184_v28, %v973_v15  ;;  %v959_v62 = vmul.f32 2.0, %v957_v34 }
 0x192   : > { %v992_v28 = vsel %vm2252_vm2, %v2192_v32, %v988_v22  ;;  %v982_v4 = vsel %vm979_vm1, %v981_v24, %v977_v3  ;;  %v1246_v34 = vor.u32 1.1754944e-38, %v1245_v54  ;;  %v953_v3 = vadd.f32 %v951_v30, %v943_v61 }
 0x193   : > { %v882_v16 = vsub.f32 0.0, %v880_v10  ;;  %v1054_v13 = vmul.f32 %v1053_v18, %v2141_v19  ;;  %v1237_v10 = vmul.f32 %v2221_v50, %v1236_v35  ;;  %v983_v63 = vmul.f32 %v982_v4, %v960_v55 }
 0x194   : > { %v1068_v51 = vsel %vm1067_vm10, %v2117_v45, %v1066_v6 }
 0x195   : > { %v1056_v32 = vsel %vm1055_vm4, %v2141_v19, %v1054_v13  ;;  %v1238_v18 = vadd.f32 %v2221_v50, %v1237_v10 }
 0x197   : > { %v1242_v25 = vsel %vm2286_vm8, %v2221_v50, %v1238_v18  ;;  %v1084_v50 = vsub.f32 %v2154_v8, %v1082_v57 }
 0x198   : > { %v2176_v53 = vpop.permute.xlu2 %876 }
 0x199   : > { %v881_v12 = vmul.f32 %v879_v47, %v2176_v53  ;;  %v1086_v61 = vand.u32 2147483647, %v1084_v50 }
 0x1a1   : > { %v2190_v31 = vpop.permute.xlu2 %898 }
 0x1a2   : > { %v906_v9 = vmul.f32 %v905_v26, %v2190_v31  ;;  %v1058_v31 = vand.u32 2147483648, %v2141_v19  ;;  %v997_v19 = vsel %vm2256_vm3, %v996_v37, %v992_v28 }
 0x1a4   : > { %v1059_v24 = vsel %vm1057_vm7, %v1058_v31, %v1056_v32  ;;  %v1071_v31 = vsel %vm1069_vm11, %v1070_v11, %v1068_v51 }
 0x1a5   : > { %v1332_v33 = vmul.f32 0.5, %v1059_v24 }
 0x1a8   : > { %v886_v2 = vpop.permute.xlu0 %885 }
 0x1a9   : > { %v2214_v44 = vpop.permute.xlu2 %902  ;;  %v893_v38 = vmul.f32 %v892_v60, %v886_v2  ;;  %v931_v2 = vperm.slane %v2208_v0, 4 }
 0x1aa   : > { %v907_v13 = vmul.f32 %v905_v26, %v2214_v44  ;;  %v1134_v44 = vsub.f32 %v2182_v27, %v1132_v52  ;;  %v1198_v52 = vsub.f32 %v2162_v17, %v1196_v58  ;;  %v1333_v17 = vmul.f32 0.5, %v1071_v31 }
 0x1ab   : > { %v895_v43 = vsub.f32 %v882_v16, %v893_v38  ;;  %v999_v16 = vsub.f32 1.0, %v983_v63  ;;  %v1107_v63 = vand.u32 2147483647, %v1105_v42 }
 0x1ac   : > { %v1136_v0 = vand.u32 2147483647, %v1134_v44 }
 0x1ad   : > { %v908_v15 = vsub.f32 %v895_v43, %v906_v9  ;;  %v1199_v43 = vand.u32 2147483647, %v1197_v1  ;;  %v955_v9 = vmul.f32 0.00390625, %v953_v3  ;;  %v1109_v45 = vadd.f32 %v1107_v63, %v1086_v61 }
 0x1b0   : > { %v890_v39 = vpop.permute.xlu1 %889 }
 0x1b1   : > { %v894_v38 = vmul.f32 %v892_v60, %v890_v39  ;;  %v883_v39 = vsub.f32 0.0, %v881_v12 }
 0x1b2   : > { %v912_v49 = vpop.permute.xlu2 %911 }
 0x1b3   : > { %v919_v23 = vmul.f32 %v918_v29, %v912_v49  ;;  %v961_v49 = vadd.f32 1.0, %v959_v62  ;;  %v896_v35 = vsub.f32 %v883_v39, %v894_v38  ;;  %v1200_v38 = vand.u32 2147483647, %v1198_v52 }
 0x1b5   : > { %v921_v56 = vsub.f32 %v908_v15, %v919_v23  ;;  %v998_v55 = vmul.f32 %v997_v19, %v961_v49  ;;  %v909_v28 = vsub.f32 %v896_v35, %v907_v13  ;;  %v1338_v23 = vmul.f32 0.01, %v1199_v43 }
 0x1b6   : > { %v1327_v15 = vmul.f32 20.0, %v955_v9  ;;  %v1339_v1 = vmul.f32 0.01, %v1200_v38 }
 0x1b9   : > { %v925_v48 = vpop.permute.xlu1 %924 }
 0x1ba   : > { %v932_v53 = vmul.f32 %v931_v2, %v925_v48  ;;  %v916_v47 = vpop.permute.xlu2 %915 }
 0x1bb   : > { %v920_v37 = vmul.f32 %v918_v29, %v916_v47  ;;  %v1138_v47 = vadd.f32 %v1136_v0, %v1109_v45 }
 0x1bc   : > { %v934_v22 = vsub.f32 %v921_v56, %v932_v53 }
 0x1bd   : > { %v922_v8 = vsub.f32 %v909_v28, %v920_v37 }
 0x1be   : > { %v1328_v40 = vadd.f32 %v1326_v59, %v934_v22  ;;  %v1247_v59 = vsel %vm1244_vm9, %v1246_v34, %v1242_v25 }
 0x1bf   : > { %v1278_v26 = vrot.slane %v1247_v59, 7  ;;  %v1304_v29 = vrot.slane %v1247_v59, 6  ;;  %v1251_v10 = vmul.f32 %v1247_v59, %v2119_v46 }
 0x1c0   : > { %v1330_v7 = vadd.f32 %v1328_v40, %v999_v16 }
 0x1c1   : > { %v1280_v32 = vmul.f32 %v1278_v26, %v2119_v46  ;;  %v1262_v54 = vperm.slane %v1251_v10, 0 }
 0x1c2   : > { %v1334_v62 = vadd.f32 %v1332_v33, %v1330_v7  ;;  %v1289_v39 = vpop.permute.xlu1 %1288 }
 0x1c3   : > { %v929_v5 = vpop.permute.xlu2 %928  ;;  %v1291_v56 = vperm.slane %v1280_v32, 1  ;;  %v1263_v30 = vmul.f32 %v1262_v54, %v2212_v41  ;;  %v1264_v35 = vmul.f32 %v1262_v54, %v2205_v36 }
 0x1c4   : > { %v1336_v57 = vadd.f32 %v1334_v62, %v2138_v14  ;;  %v933_v4 = vmul.f32 %v931_v2, %v929_v5  ;;  %v1306_v14 = vmul.f32 %v1304_v29, %v2119_v46  ;;  %v1000_v2 = vsub.f32 1.0, %v998_v55  ;;  %v1310_v46 = vpop.permute.xlu0 %1309 }
 0x1c5   : > { %v1293_v19 = vmul.f32 %v1291_v56, %v1289_v39 }
 0x1c6   : > { %v1340_v27 = vadd.f32 %v1338_v23, %v1336_v57  ;;  %v935_v12 = vsub.f32 %v922_v8, %v933_v4  ;;  %v1317_v53 = vperm.slane %v1306_v14, 2 }
 0x1c7   : > { %v1295_v40 = vadd.f32 %v1293_v19, %v1264_v35 }
 0x1c8   : > { %v1329_v48 = vadd.f32 %v1327_v15, %v935_v12  ;;  %1342 = vst [vmem:[%s2322_s18] sm:$0xff] %v1340_v27  ;;  %v1318_v22 = vmul.f32 %v1317_v53, %v1310_v46 }
 0x1ca   : > { %v1331_v58 = vadd.f32 %v1329_v48, %v1000_v2 }
 0x1cc   : > { %v1335_v18 = vadd.f32 %v1333_v17, %v1331_v58  ;;  %v1284_v20 = vpop.permute.xlu2 %1283 }
 0x1cd   : > { %v1292_v21 = vmul.f32 %v1291_v56, %v1284_v20 }
 0x1ce   : > { %v1337_v60 = vadd.f32 %v1335_v18, %v1138_v47 }
 0x1cf   : > { %v1294_v24 = vadd.f32 %v1292_v21, %v1263_v30 }
 0x1d0   : > { %v1341_v16 = vadd.f32 %v1339_v1, %v1337_v60 }
 0x1d1   : > { %v1320_v49 = vadd.f32 %v1318_v22, %v1294_v24 }
 0x1d2   : > { %1343 = vst [vmem:[%s2322_s18 + $0x8] sm:$0xff] %v1341_v16 }
 0x1d3   : > { %v1597_v34 = vclamps-f32 %v1320_v49, 0.999999 }
 0x1d5   : > { %1599 = vst [vmem:[%s2322_s18 + $0x10] sm:$0xff] %v1597_v34  ;;  %v1315_v41 = vpop.permute.xlu2 %1314 }
 0x1d6   : > { %v1319_v3 = vmul.f32 %v1317_v53, %v1315_v41 }
 0x1d8   : > { %v1321_v25 = vadd.f32 %v1319_v3, %v1295_v40 }
 0x1da   : > { %v1598_v33 = vclamps-f32 %v1321_v25, 0.999999 }
 0x1dc   : > { %1600 = vst [vmem:[%s2322_s18 + $0x18] sm:$0xff] %v1598_v33 }
 0x1dd   : > { %1787 = shalt.err (!%p1784_p5)
}
 0x1de   : > { %s1850_s23 = smov 128   ;;  %s1851_s18 = smov 8  }
 0x1df   : > { %1616 = dma.vmem_to_hbm [thread:$0]  (%p1942_p4), %s1363_s25, 512, %s1365_s27, %s1348_s12, %s1850_s23, %s1850_s23, %s1851_s18  }
 0x1e0 PF: > { %p1622_p6 = scmp.ge.s32.totalorder %s1838_s14, 2  ;;  %s1379_s13 = sand.u32 1, %s1818_s30  }
 0x1e1   : > { %s1380_s17 = scalar_lea.sflag [#allocation7], %s1379_s13 }
 0x1e2   : > { %p1619_p7 = pnand %p1622_p6, %p1949_p8 }
 0x1e4   : > { %p1620_p9 = pneg %p1619_p7 }
 0x1e6   : > { %1813 = dma.done.wait (%p1620_p9), %s1380_s17, 512  }
 0x1e7   : > { %1815 = vsyncadd (%p1620_p9), %s1380_s17, 4294966784  ;;  %s22_s14 = sadd.s32 1, %s1838_s14   ;;  %s2394_s22 = sld [smem:[#allocation11_spill]] }
 0x1e8   : > { %p19_p10 = scmp.ge.s32.totalorder %s22_s14, 4   ;;  %s2395_s12 = sld [smem:[#allocation9_spill]] }
 0x1e9   : > { %s2396_s13 = sld [smem:[#allocation10_spill]]  ;;  %s2397_s30 = smov %s1822_s10 }
 0x1ea   : > { %s2398_s10 = smov %s1826_s11  ;;  %21 = sbr.rel (!%p19_p10) target bundleno = 4 (0x4), region = 124 }
 0x1ed   : > { %s2399_s11 = smov %s2394_s22 }
 0x1ef   :  { %1386 = vsyncpa [#allocation7], 1 }
 0x1f0   :  { %1388 = vsyncpa [#allocation7 + $0x1], 1 }

</bundles_post_ra>
